<compile_context>
chip_gen: v6e
topology: v6e:2x2x1
jax: 0.10.0
libtpu: 0.0.40
codegen_flags: <defaults>
</compile_context>

<pallas_src>
import numpy as np
import jax
import jax.numpy as jnp
from jax.experimental import pallas as pl
from jax.experimental.pallas import tpu as pltpu


# ----------------------------------------------------------------------------
# Deterministic "weights" / constant helpers (module __init__ equivalents).
# ----------------------------------------------------------------------------

def get_sobel_kernel_np(k):
    """Smoothed-gradient (Sobel-like) kernel pair, shape [2, k, k] (x-deriv, y-deriv)."""
    r = np.linspace(-(k // 2), k // 2, k)
    x, y = np.meshgrid(r, r, indexing="ij")
    den = x * x + y * y
    den[:, k // 2] = 1.0          # avoid div-by-zero on the central column
    s = (x / den).astype(np.float32)
    return np.stack([s, s.T], axis=0)           # [2, k, k]


def get_grid(h, w):
    """Normalized coordinate grid, [1, h, w, 2] (x, y) in [0, 1] (align_corners)."""
    y = jnp.linspace(0.0, 1.0, h)
    x = jnp.linspace(0.0, 1.0, w)
    gy, gx = jnp.meshgrid(y, x, indexing="ij")
    return jnp.stack([gx, gy], axis=-1)[None]


# ----------------------------------------------------------------------------
# VMEM planning: honest accounting of resident planes + finalize temporaries.
# ----------------------------------------------------------------------------

def _plan_tiles(h, w, c, in_itemsize):
    plane = h * w * 4
    resident = 2 * (2 * plane)         # u, v f32 output planes (x2 buffering safety)
    resident += 2 * (h * w)            # int8 mask plane (x2)
    resident += plane                  # boundary scratch plane
    finalize_tmp = 6 * plane           # pooling / reduction temporaries estimate
    try:
        phys = int(pltpu.get_tpu_info().vmem_capacity_bytes)
    except Exception:
        phys = 64 * 1024 * 1024        # v7x per-TC VMEM (most conservative)
    budget = int(phys * 0.85)
    input_budget = max(budget - resident - finalize_tmp, 4 * 1024 * 1024)

    gran = 16 if in_itemsize < 4 else 8          # bf16 sublane packing -> 16-row steps
    tile_rows = h                                # fallback: single full-height block
    limit = (h // 2) // gran * gran
    for tr in range(limit, gran - 1, -gran):
        if h % tr == 0 and 2 * 2 * c * tr * w * in_itemsize <= input_budget:
            tile_rows = tr
            break

    need = (resident + finalize_tmp
            + 2 * 2 * c * tile_rows * w * in_itemsize + (2 << 20))
    vmem_limit = int(min(0.9 * phys, max(1.3 * need, 32 * 1024 * 1024)))
    return tile_rows, vmem_limit


# ----------------------------------------------------------------------------
# Fused kernel: flow head (constant-weight FMAs) + streamed motion boundaries.
# ----------------------------------------------------------------------------

def make_fused_kernel(c, h, w, tile_rows, wu, wv, bu, bv,
                      boundaries_size, boundaries_dilation, boundaries_thresh):
    ksize = boundaries_size * 2 + 1
    pad = ksize // 2
    dil = boundaries_dilation
    sobel = get_sobel_kernel_np(ksize)          # compile-time constants (general-K path)
    eps = 1e-12
    big_neg = float(np.float32(-3.0e38))
    n_tiles = h // tile_rows
    inv_w1 = 1.0 / float(w - 1)
    inv_h1 = 1.0 / float(h - 1)

    # ---- lane-axis reflected neighbours via roll + iota edge fixups ---------
    def reflect_lr(x):
        wloc = x.shape[1]
        col = jax.lax.broadcasted_iota(jnp.int32, x.shape, 1)
        rl = pltpu.roll(x, 1, axis=1)            # circular x[:, j-1]
        rr = pltpu.roll(x, wloc - 1, axis=1)     # circular x[:, j+1]
        xl = jnp.where(col == 0, rr, rl)         # reflect: col 0    -> x[:, 1]
        xr = jnp.where(col == wloc - 1, rl, rr)  # reflect: col w-1  -> x[:, w-2]
        return xl, xr

    # ---- separable 3x3 smoothed-gradient magnitude for one row tile ---------
    # x_ext: (n + 2, w) = [top halo, tile rows, bottom halo]; halo rows already
    # reflection-resolved by the caller.  Returns (n, w).
    def grad_mag_tile(x_ext):
        n = x_ext.shape[0] - 2
        xl, xr = reflect_lr(x_ext)
        s = 0.5 * (xl + xr) + x_ext                               # horiz. smoothing
        gx = s[2:, :] - s[:n, :]                                  # vertical gradient
        vsm = 0.5 * (x_ext[:n, :] + x_ext[2:, :]) + x_ext[1:n + 1, :]  # vert. smoothing
        vl, vr = reflect_lr(vsm)
        gy = vr - vl                                              # horizontal gradient
        return jnp.sqrt(gx * gx + gy * gy + eps)

    def boundary_tile(u_ref, v_ref, r0, top, bot):
        def ext(ref):
            return jnp.concatenate(
                [ref[pl.ds(top, 1), :], ref[pl.ds(r0, tile_rows), :],
                 ref[pl.ds(bot, 1), :]], axis=0)
        gm_u = grad_mag_tile(ext(u_ref))
        gm_v = grad_mag_tile(ext(v_ref))
        # Normalization scales folded into the (linear) gradient: eps shifts
        # inside the scaled sqrt by ~inv^2 * eps, negligible at 1e-12.
        return 0.5 * (inv_w1 * gm_u + inv_h1 * gm_v)

    # ---- general (boundaries_size > 1) fallback: full-plane pad + conv ------
    def reflect_pad2d(x):
        if pad == 0:
            return x
        rows = [x[pad - k:pad - k + 1, :] for k in range(pad)]
        rows.append(x)
        rows += [x[h - 2 - k:h - 1 - k, :] for k in range(pad)]
        xp = jnp.concatenate(rows, axis=0)
        cols = [xp[:, pad - k:pad - k + 1] for k in range(pad)]
        cols.append(xp)
        cols += [xp[:, w - 2 - k:w - 1 - k] for k in range(pad)]
        return jnp.concatenate(cols, axis=1)

    def grad_mag_full(xp):
        def conv_k(k2d):
            acc = jnp.zeros((h, w), jnp.float32)
            for di in range(ksize):
                for dj in range(ksize):
                    wgt = float(k2d[di, dj])
                    if wgt != 0.0:
                        acc = acc + wgt * xp[di:di + h, dj:dj + w]
            return acc
        gx = conv_k(sobel[0])
        gy = conv_k(sobel[1])
        return jnp.sqrt(gx * gx + gy * gy + eps)

    # ---- sliding-window max (window `window`) via log2 doubling tree --------
    def sliding_max(x, axis, window, out_len):
        def sl(a, start, length):
            return a[start:start + length, :] if axis == 0 else a[:, start:start + length]
        cur = x
        cur_len = x.shape[axis]
        win = 1
        while win * 2 <= window:
            cur = jnp.maximum(sl(cur, 0, cur_len - win), sl(cur, win, cur_len - win))
            cur_len -= win
            win *= 2
        res = sl(cur, 0, out_len)
        off = window - win
        if off > 0:
            res = jnp.maximum(res, sl(cur, off, out_len))
        return res

    def kernel(src_ref, tgt_ref, u_ref, v_ref, mask_ref, b_ref):
        i = pl.program_id(0)
        s = src_ref[...].astype(jnp.float32)        # bf16 -> f32 (arithmetic stays f32)
        t = tgt_ref[...].astype(jnp.float32)

        # ---- flow head: constant-weighted per-pixel FMAs (no MXU, no weight DMA)
        u = jnp.full((tile_rows, w), bu, jnp.float32)
        v = jnp.full((tile_rows, w), bv, jnp.float32)
        for cc in range(c):
            sc = s[cc]
            tc = t[cc]
            u = u + sc * wu[cc] + tc * wu[c + cc]
            v = v + sc * wv[cc] + tc * wv[c + cc]

        r0 = pl.multiple_of(i * tile_rows, tile_rows)
        u_ref[pl.ds(r0, tile_rows), :] = u          # lane-dense plane stores
        v_ref[pl.ds(r0, tile_rows), :] = v

        if ksize == 3 and n_tiles > 1:
            # ---- streamed gradient, lagged by one tile: tile i-1's 1-row halo
            # (first row of tile i / last row of tile i-2) is resident now.
            @pl.when(i > 0)
            def _grad_prev():
                tp = i - 1
                rp = tp * tile_rows
                top = jnp.where(tp > 0, rp - 1, 1)          # global top reflect -> row 1
                bot = rp + tile_rows                        # first row of tile i
                b_ref[pl.ds(rp, tile_rows), :] = boundary_tile(u_ref, v_ref, rp, top, bot)

        # ---- finalize: last tile's gradient + pooling + threshold -----------
        @pl.when(i == n_tiles - 1)
        def _finalize():
            if ksize == 3:
                rp = (n_tiles - 1) * tile_rows
                top = rp - 1 if n_tiles > 1 else 1          # reflect if single tile
                bot = h - 2                                 # global bottom reflect
                b_ref[pl.ds(rp, tile_rows), :] = boundary_tile(u_ref, v_ref, rp, top, bot)
                b = b_ref[...]
            else:
                b = 0.5 * (inv_w1 * grad_mag_full(reflect_pad2d(u_ref[...]))
                           + inv_h1 * grad_mag_full(reflect_pad2d(v_ref[...])))

            if dil > 1:
                # max_pool2d(kernel=2*dil, stride=1, padding=dil)[..., -h:, -w:]
                # == separable sliding max over offsets [-(dil-1), +dil], -inf padded.
                L = 2 * dil
                bp = jnp.concatenate(
                    [jnp.full((dil - 1, w), big_neg, jnp.float32), b,
                     jnp.full((dil, w), big_neg, jnp.float32)], axis=0)
                rmax = sliding_max(bp, 0, L, h)
                bp2 = jnp.concatenate(
                    [jnp.full((h, dil - 1), big_neg, jnp.float32), rmax,
                     jnp.full((h, dil), big_neg, jnp.float32)], axis=1)
                pooled = sliding_max(bp2, 1, L, w)
            else:
                pooled = b

            # (pooled - mn)/(mx - mn) > thresh  <=>  pooled > mn + thresh*(mx - mn)
            # Degenerate constant field (mx == mn) -> all False, no NaN/Inf.
            mn = jnp.min(pooled)
            mx = jnp.max(pooled)
            thr = mn + boundaries_thresh * (mx - mn)
            # two-step cast keeps the i1 -> i8 lowering on well-trodden paths
            mask_ref[...] = (pooled > thr).astype(jnp.int32).astype(jnp.int8)

    return kernel


# ----------------------------------------------------------------------------
# Module wrapper (mirrors OpticalFlow).
# ----------------------------------------------------------------------------

class OpticalFlowPallas:
    def __init__(self, height, width, patch_size=4, num_channels=3):
        self.height, self.width = height, width
        self.num_channels = num_channels
        ch, cw = height // patch_size, width // patch_size
        self.coarse_grid = get_grid(ch, cw)          # registered buffer equivalent

        # Deterministic stand-in flow-head parameters (replace RAFT weights).
        k = 2 * num_channels
        wmat = (np.arange(k * 2, dtype=np.float32).reshape(k, 2) / (k * 2)) - 0.25
        self.flow_w = wmat                                   # [2C, 2]
        self.flow_b = np.array([0.5, -0.5], dtype=np.float32)

    def get_motion_boundaries(self, data, boundaries_size=1, boundaries_dilation=4,
                              boundaries_thresh=0.025, frame_dtype=jnp.bfloat16,
                              **kwargs):
        src, tgt = data["src_frame"], data["tgt_frame"]
        b, c, h, w = src.shape
        assert b == 1

        # HBM/DMA format only: arithmetic stays f32 inside the kernel (v5e-safe).
        src_p = src[0] if src.dtype == frame_dtype else src[0].astype(frame_dtype)
        tgt_p = tgt[0] if tgt.dtype == frame_dtype else tgt[0].astype(frame_dtype)
        itemsize = jnp.dtype(src_p.dtype).itemsize

        tile_rows, vmem_limit = _plan_tiles(h, w, c, itemsize)
        n_tiles = h // tile_rows

        wu = [float(x) for x in self.flow_w[:, 0]]
        wv = [float(x) for x in self.flow_w[:, 1]]
        kern = make_fused_kernel(c, h, w, tile_rows, wu, wv,
                                 float(self.flow_b[0]), float(self.flow_b[1]),
                                 boundaries_size, boundaries_dilation,
                                 boundaries_thresh)

        u_plane, v_plane, mask_i8 = pl.pallas_call(
            kern,
            out_shape=(jax.ShapeDtypeStruct((h, w), jnp.float32),   # flow u-plane
                       jax.ShapeDtypeStruct((h, w), jnp.float32),   # flow v-plane
                       jax.ShapeDtypeStruct((h, w), jnp.int8)),     # boundary mask
            grid=(n_tiles,),
            in_specs=[
                pl.BlockSpec((c, tile_rows, w), lambda i: (0, i, 0)),
                pl.BlockSpec((c, tile_rows, w), lambda i: (0, i, 0)),
            ],
            out_specs=(
                pl.BlockSpec((h, w), lambda i: (0, 0)),   # resident across the grid
                pl.BlockSpec((h, w), lambda i: (0, 0)),
                pl.BlockSpec((h, w), lambda i: (0, 0)),
            ),
            scratch_shapes=[pltpu.VMEM((h, w), jnp.float32)],        # streamed-b plane
            compiler_params=pltpu.CompilerParams(
                dimension_semantics=("arbitrary",),       # resident outputs + global reduce
                vmem_limit_bytes=vmem_limit),
        )(src_p, tgt_p)

        # Deliberate layout conversion to the reference channel-last flow; callers
        # that accept planar flow should consume (u_plane, v_plane) directly.
        flow = jnp.stack([u_plane, v_plane], axis=-1)[None]      # [1, H, W, 2]
        motion_boundaries = (mask_i8 != 0)[None]                 # cheap int8 -> bool
        return {"motion_boundaries": motion_boundaries, "flow": flow}

    def forward(self, data, mode, **kwargs):
        if mode == "motion_boundaries":
            return self.get_motion_boundaries(data, **kwargs)
        # TODO(synk): other modes require the full RAFT / torch3d interpolation stack.
        raise NotImplementedError(f"mode {mode} not implemented in the Pallas port")

    __call__ = forward


# ----------------------------------------------------------------------------
# Demo
# ----------------------------------------------------------------------------

if __name__ == "__main__":
    # Lane-aligned small shapes: W multiple of 128, H multiple of 16 so the bf16
    # row tiling gives 2 grid steps (exercises the streamed-gradient path).
    H, W, C = 32, 128, 3
    key = jax.random.PRNGKey(0)
    k1, k2 = jax.random.split(key)
    src_frame = jax.random.normal(k1, (1, C, H, W), dtype=jnp.bfloat16)
    tgt_frame = jax.random.normal(k2, (1, C, H, W), dtype=jnp.bfloat16)

    model = OpticalFlowPallas(H, W, patch_size=4, num_channels=C)
    out = model({"src_frame": src_frame, "tgt_frame": tgt_frame}, mode="motion_boundaries")

    jax.block_until_ready(out["motion_boundaries"])
    jax.block_until_ready(out["flow"])
    assert out["flow"].shape == (1, H, W, 2)
    assert out["motion_boundaries"].shape == (1, H, W)
    assert out["motion_boundaries"].dtype == jnp.bool_
    print("KERNEL_OK")
</pallas_src>

<mosaic_0001>
module attributes {stable_mosaic.version = 11 : i64} {
  func.func @kernel(%arg0: i32, %arg1: memref<3x16x128xbf16, #tpu.memory_space<vmem>>, %arg2: memref<3x16x128xbf16, #tpu.memory_space<vmem>>, %arg3: memref<32x128xf32, #tpu.memory_space<vmem>>, %arg4: memref<32x128xf32, #tpu.memory_space<vmem>>, %arg5: memref<32x128xi8, #tpu.memory_space<vmem>>, %arg6: memref<32x128xf32, #tpu.memory_space<vmem>>) attributes {dimension_semantics = [#tpu.dimension_semantics<arbitrary>], iteration_bounds = array<i64: 2>, scalar_prefetch = 0 : i64, scratch_operands = 1 : i64, tpu.core_type = #tpu.core_type<tc>, window_params = [{transform_indices = @transform_0, window_bounds = array<i64: 3, 16, 128>}, {transform_indices = @transform_1, window_bounds = array<i64: 3, 16, 128>}, {pipeline_mode = #tpu.pipeline_mode<synchronous>, transform_indices = @transform_2, window_bounds = array<i64: 32, 128>}, {pipeline_mode = #tpu.pipeline_mode<synchronous>, transform_indices = @transform_3, window_bounds = array<i64: 32, 128>}, {pipeline_mode = #tpu.pipeline_mode<synchronous>, transform_indices = @transform_4, window_bounds = array<i64: 32, 128>}]} {
    %c0 = arith.constant 0 : index
    %c0_0 = arith.constant 0 : index
    %c0_1 = arith.constant 0 : index
    %0 = vector.load %arg1[%c0, %c0_0, %c0_1] : memref<3x16x128xbf16, #tpu.memory_space<vmem>>, vector<3x16x128xbf16>
    %1 = arith.extf %0 : vector<3x16x128xbf16> to vector<3x16x128xf32>
    %c0_2 = arith.constant 0 : index
    %c0_3 = arith.constant 0 : index
    %c0_4 = arith.constant 0 : index
    %2 = vector.load %arg2[%c0_2, %c0_3, %c0_4] : memref<3x16x128xbf16, #tpu.memory_space<vmem>>, vector<3x16x128xbf16>
    %3 = arith.extf %2 : vector<3x16x128xbf16> to vector<3x16x128xf32>
    %cst = arith.constant 5.000000e-01 : f32
    %4 = vector.broadcast %cst : f32 to vector<16x128xf32>
    %cst_5 = arith.constant -5.000000e-01 : f32
    %5 = vector.broadcast %cst_5 : f32 to vector<16x128xf32>
    %6 = vector.extract_strided_slice %1 {offsets = [0, 0, 0], sizes = [1, 16, 128], strides = [1, 1, 1]} : vector<3x16x128xf32> to vector<1x16x128xf32>
    %7 = vector.shape_cast %6 : vector<1x16x128xf32> to vector<16x128xf32>
    %8 = vector.extract_strided_slice %3 {offsets = [0, 0, 0], sizes = [1, 16, 128], strides = [1, 1, 1]} : vector<3x16x128xf32> to vector<1x16x128xf32>
    %9 = vector.shape_cast %8 : vector<1x16x128xf32> to vector<16x128xf32>
    %cst_6 = arith.constant -2.500000e-01 : f32
    %10 = vector.broadcast %cst_6 : f32 to vector<16x128xf32>
    %11 = arith.mulf %7, %10 : vector<16x128xf32>
    %12 = arith.addf %4, %11 : vector<16x128xf32>
    %cst_7 = arith.constant 2.500000e-01 : f32
    %13 = vector.broadcast %cst_7 : f32 to vector<16x128xf32>
    %14 = arith.mulf %9, %13 : vector<16x128xf32>
    %15 = arith.addf %12, %14 : vector<16x128xf32>
    %cst_8 = arith.constant -0.166666657 : f32
    %16 = vector.broadcast %cst_8 : f32 to vector<16x128xf32>
    %17 = arith.mulf %7, %16 : vector<16x128xf32>
    %18 = arith.addf %5, %17 : vector<16x128xf32>
    %cst_9 = arith.constant 0.333333313 : f32
    %19 = vector.broadcast %cst_9 : f32 to vector<16x128xf32>
    %20 = arith.mulf %9, %19 : vector<16x128xf32>
    %21 = arith.addf %18, %20 : vector<16x128xf32>
    %22 = vector.extract_strided_slice %1 {offsets = [1, 0, 0], sizes = [1, 16, 128], strides = [1, 1, 1]} : vector<3x16x128xf32> to vector<1x16x128xf32>
    %23 = vector.shape_cast %22 : vector<1x16x128xf32> to vector<16x128xf32>
    %24 = vector.extract_strided_slice %3 {offsets = [1, 0, 0], sizes = [1, 16, 128], strides = [1, 1, 1]} : vector<3x16x128xf32> to vector<1x16x128xf32>
    %25 = vector.shape_cast %24 : vector<1x16x128xf32> to vector<16x128xf32>
    %cst_10 = arith.constant -0.0833333284 : f32
    %26 = vector.broadcast %cst_10 : f32 to vector<16x128xf32>
    %27 = arith.mulf %23, %26 : vector<16x128xf32>
    %28 = arith.addf %15, %27 : vector<16x128xf32>
    %cst_11 = arith.constant 0.416666687 : f32
    %29 = vector.broadcast %cst_11 : f32 to vector<16x128xf32>
    %30 = arith.mulf %25, %29 : vector<16x128xf32>
    %31 = arith.addf %28, %30 : vector<16x128xf32>
    %cst_12 = arith.constant 0.000000e+00 : f32
    %32 = vector.broadcast %cst_12 : f32 to vector<16x128xf32>
    %33 = arith.mulf %23, %32 : vector<16x128xf32>
    %34 = arith.addf %21, %33 : vector<16x128xf32>
    %cst_13 = arith.constant 5.000000e-01 : f32
    %35 = vector.broadcast %cst_13 : f32 to vector<16x128xf32>
    %36 = arith.mulf %25, %35 : vector<16x128xf32>
    %37 = arith.addf %34, %36 : vector<16x128xf32>
    %38 = vector.extract_strided_slice %1 {offsets = [2, 0, 0], sizes = [1, 16, 128], strides = [1, 1, 1]} : vector<3x16x128xf32> to vector<1x16x128xf32>
    %39 = vector.shape_cast %38 : vector<1x16x128xf32> to vector<16x128xf32>
    %40 = vector.extract_strided_slice %3 {offsets = [2, 0, 0], sizes = [1, 16, 128], strides = [1, 1, 1]} : vector<3x16x128xf32> to vector<1x16x128xf32>
    %41 = vector.shape_cast %40 : vector<1x16x128xf32> to vector<16x128xf32>
    %cst_14 = arith.constant 0.0833333432 : f32
    %42 = vector.broadcast %cst_14 : f32 to vector<16x128xf32>
    %43 = arith.mulf %39, %42 : vector<16x128xf32>
    %44 = arith.addf %31, %43 : vector<16x128xf32>
    %cst_15 = arith.constant 0.583333313 : f32
    %45 = vector.broadcast %cst_15 : f32 to vector<16x128xf32>
    %46 = arith.mulf %41, %45 : vector<16x128xf32>
    %47 = arith.addf %44, %46 : vector<16x128xf32>
    %cst_16 = arith.constant 0.166666657 : f32
    %48 = vector.broadcast %cst_16 : f32 to vector<16x128xf32>
    %49 = arith.mulf %39, %48 : vector<16x128xf32>
    %50 = arith.addf %37, %49 : vector<16x128xf32>
    %cst_17 = arith.constant 0.666666686 : f32
    %51 = vector.broadcast %cst_17 : f32 to vector<16x128xf32>
    %52 = arith.mulf %41, %51 : vector<16x128xf32>
    %53 = arith.addf %50, %52 : vector<16x128xf32>
    %c16_i32 = arith.constant 16 : i32
    %54 = arith.muli %arg0, %c16_i32 : i32
    %55 = tpu.assume_multiple %54, 16 : i32
    %56 = arith.index_cast %55 : i32 to index
    %c0_18 = arith.constant 0 : index
    %57 = vector.load %arg3[%56, %c0_18] : memref<32x128xf32, #tpu.memory_space<vmem>>, vector<16x128xf32>
    tpu.vector_store %arg3[%56, %c0_18], %47 {strides = array<i32>} : memref<32x128xf32, #tpu.memory_space<vmem>>, vector<16x128xf32>,
    %58 = arith.index_cast %55 : i32 to index
    %c0_19 = arith.constant 0 : index
    %59 = vector.load %arg4[%58, %c0_19] : memref<32x128xf32, #tpu.memory_space<vmem>>, vector<16x128xf32>
    tpu.vector_store %arg4[%58, %c0_19], %53 {strides = array<i32>} : memref<32x128xf32, #tpu.memory_space<vmem>>, vector<16x128xf32>,
    %c0_i32 = arith.constant 0 : i32
    %60 = arith.cmpi sgt, %arg0, %c0_i32 : i32
    %61 = arith.extui %60 : i1 to i32
    %c0_i32_20 = arith.constant 0 : i32
    %62 = arith.cmpi ne, %61, %c0_i32_20 : i32
    scf.if %62 {
      %c1_i32_22 = arith.constant 1 : i32
      %66 = arith.subi %arg0, %c1_i32_22 : i32
      %c16_i32_23 = arith.constant 16 : i32
      %67 = arith.muli %66, %c16_i32_23 : i32
      %c0_i32_24 = arith.constant 0 : i32
      %68 = arith.cmpi sgt, %66, %c0_i32_24 : i32
      %c1_i32_25 = arith.constant 1 : i32
      %69 = arith.subi %67, %c1_i32_25 : i32
      %c1_i32_26 = arith.constant 1 : i32
      %70 = arith.select %68, %69, %c1_i32_26 : i32
      %c16_i32_27 = arith.constant 16 : i32
      %71 = arith.addi %67, %c16_i32_27 : i32
      %72 = arith.index_cast %70 : i32 to index
      %c0_28 = arith.constant 0 : index
      %73 = vector.load %arg3[%72, %c0_28] : memref<32x128xf32, #tpu.memory_space<vmem>>, vector<1x128xf32>
      %74 = arith.index_cast %67 : i32 to index
      %c0_29 = arith.constant 0 : index
      %75 = vector.load %arg3[%74, %c0_29] : memref<32x128xf32, #tpu.memory_space<vmem>>, vector<16x128xf32>
      %76 = arith.index_cast %71 : i32 to index
      %c0_30 = arith.constant 0 : index
      %77 = vector.load %arg3[%76, %c0_30] : memref<32x128xf32, #tpu.memory_space<vmem>>, vector<1x128xf32>
      %78 = tpu.concatenate %73, %75, %77 in 0 : vector<1x128xf32>, vector<16x128xf32>, vector<1x128xf32> -> vector<18x128xf32>
      %79 = tpu.iota {dimensions = array<i32: 1>} : vector<18x128xi32>
      %c1_i32_31 = arith.constant 1 : i32
      %80 = tpu.dynamic_rotate %78 by %c1_i32_31 dim 1 : vector<18x128xf32>, i32 -> vector<18x128xf32>
      %c127_i32 = arith.constant 127 : i32
      %81 = tpu.dynamic_rotate %78 by %c127_i32 dim 1 : vector<18x128xf32>, i32 -> vector<18x128xf32>
      %c0_i32_32 = arith.constant 0 : i32
      %82 = vector.broadcast %c0_i32_32 : i32 to vector<18x128xi32>
      %83 = arith.cmpi eq, %79, %82 : vector<18x128xi32>
      %84 = arith.select %83, %81, %80 : vector<18x128xi1>, vector<18x128xf32>
      %c127_i32_33 = arith.constant 127 : i32
      %85 = vector.broadcast %c127_i32_33 : i32 to vector<18x128xi32>
      %86 = arith.cmpi eq, %79, %85 : vector<18x128xi32>
      %87 = arith.select %86, %80, %81 : vector<18x128xi1>, vector<18x128xf32>
      %88 = arith.addf %84, %87 : vector<18x128xf32>
      %cst_34 = arith.constant 5.000000e-01 : f32
      %89 = vector.broadcast %cst_34 : f32 to vector<18x128xf32>
      %90 = arith.mulf %89, %88 : vector<18x128xf32>
      %91 = arith.addf %90, %78 : vector<18x128xf32>
      %92 = vector.extract_strided_slice %91 {offsets = [2, 0], sizes = [16, 128], strides = [1, 1]} : vector<18x128xf32> to vector<16x128xf32>
      %93 = vector.extract_strided_slice %91 {offsets = [0, 0], sizes = [16, 128], strides = [1, 1]} : vector<18x128xf32> to vector<16x128xf32>
      %94 = arith.subf %92, %93 : vector<16x128xf32>
      %95 = vector.extract_strided_slice %78 {offsets = [0, 0], sizes = [16, 128], strides = [1, 1]} : vector<18x128xf32> to vector<16x128xf32>
      %96 = vector.extract_strided_slice %78 {offsets = [2, 0], sizes = [16, 128], strides = [1, 1]} : vector<18x128xf32> to vector<16x128xf32>
      %97 = arith.addf %95, %96 : vector<16x128xf32>
      %cst_35 = arith.constant 5.000000e-01 : f32
      %98 = vector.broadcast %cst_35 : f32 to vector<16x128xf32>
      %99 = arith.mulf %98, %97 : vector<16x128xf32>
      %100 = vector.extract_strided_slice %78 {offsets = [1, 0], sizes = [16, 128], strides = [1, 1]} : vector<18x128xf32> to vector<16x128xf32>
      %101 = arith.addf %99, %100 : vector<16x128xf32>
      %102 = tpu.iota {dimensions = array<i32: 1>} : vector<16x128xi32>
      %c1_i32_36 = arith.constant 1 : i32
      %103 = tpu.dynamic_rotate %101 by %c1_i32_36 dim 1 : vector<16x128xf32>, i32 -> vector<16x128xf32>
      %c127_i32_37 = arith.constant 127 : i32
      %104 = tpu.dynamic_rotate %101 by %c127_i32_37 dim 1 : vector<16x128xf32>, i32 -> vector<16x128xf32>
      %c0_i32_38 = arith.constant 0 : i32
      %105 = vector.broadcast %c0_i32_38 : i32 to vector<16x128xi32>
      %106 = arith.cmpi eq, %102, %105 : vector<16x128xi32>
      %107 = arith.select %106, %104, %103 : vector<16x128xi1>, vector<16x128xf32>
      %c127_i32_39 = arith.constant 127 : i32
      %108 = vector.broadcast %c127_i32_39 : i32 to vector<16x128xi32>
      %109 = arith.cmpi eq, %102, %108 : vector<16x128xi32>
      %110 = arith.select %109, %103, %104 : vector<16x128xi1>, vector<16x128xf32>
      %111 = arith.subf %110, %107 : vector<16x128xf32>
      %112 = arith.mulf %94, %94 : vector<16x128xf32>
      %113 = arith.mulf %111, %111 : vector<16x128xf32>
      %114 = arith.addf %112, %113 : vector<16x128xf32>
      %cst_40 = arith.constant 9.99999996E-13 : f32
      %115 = vector.broadcast %cst_40 : f32 to vector<16x128xf32>
      %116 = arith.addf %114, %115 : vector<16x128xf32>
      %117 = math.sqrt %116 : vector<16x128xf32>
      %118 = arith.index_cast %70 : i32 to index
      %c0_41 = arith.constant 0 : index
      %119 = vector.load %arg4[%118, %c0_41] : memref<32x128xf32, #tpu.memory_space<vmem>>, vector<1x128xf32>
      %120 = arith.index_cast %67 : i32 to index
      %c0_42 = arith.constant 0 : index
      %121 = vector.load %arg4[%120, %c0_42] : memref<32x128xf32, #tpu.memory_space<vmem>>, vector<16x128xf32>
      %122 = arith.index_cast %71 : i32 to index
      %c0_43 = arith.constant 0 : index
      %123 = vector.load %arg4[%122, %c0_43] : memref<32x128xf32, #tpu.memory_space<vmem>>, vector<1x128xf32>
      %124 = tpu.concatenate %119, %121, %123 in 0 : vector<1x128xf32>, vector<16x128xf32>, vector<1x128xf32> -> vector<18x128xf32>
      %125 = tpu.iota {dimensions = array<i32: 1>} : vector<18x128xi32>
      %c1_i32_44 = arith.constant 1 : i32
      %126 = tpu.dynamic_rotate %124 by %c1_i32_44 dim 1 : vector<18x128xf32>, i32 -> vector<18x128xf32>
      %c127_i32_45 = arith.constant 127 : i32
      %127 = tpu.dynamic_rotate %124 by %c127_i32_45 dim 1 : vector<18x128xf32>, i32 -> vector<18x128xf32>
      %c0_i32_46 = arith.constant 0 : i32
      %128 = vector.broadcast %c0_i32_46 : i32 to vector<18x128xi32>
      %129 = arith.cmpi eq, %125, %128 : vector<18x128xi32>
      %130 = arith.select %129, %127, %126 : vector<18x128xi1>, vector<18x128xf32>
      %c127_i32_47 = arith.constant 127 : i32
      %131 = vector.broadcast %c127_i32_47 : i32 to vector<18x128xi32>
      %132 = arith.cmpi eq, %125, %131 : vector<18x128xi32>
      %133 = arith.select %132, %126, %127 : vector<18x128xi1>, vector<18x128xf32>
      %134 = arith.addf %130, %133 : vector<18x128xf32>
      %cst_48 = arith.constant 5.000000e-01 : f32
      %135 = vector.broadcast %cst_48 : f32 to vector<18x128xf32>
      %136 = arith.mulf %135, %134 : vector<18x128xf32>
      %137 = arith.addf %136, %124 : vector<18x128xf32>
      %138 = vector.extract_strided_slice %137 {offsets = [2, 0], sizes = [16, 128], strides = [1, 1]} : vector<18x128xf32> to vector<16x128xf32>
      %139 = vector.extract_strided_slice %137 {offsets = [0, 0], sizes = [16, 128], strides = [1, 1]} : vector<18x128xf32> to vector<16x128xf32>
      %140 = arith.subf %138, %139 : vector<16x128xf32>
      %141 = vector.extract_strided_slice %124 {offsets = [0, 0], sizes = [16, 128], strides = [1, 1]} : vector<18x128xf32> to vector<16x128xf32>
      %142 = vector.extract_strided_slice %124 {offsets = [2, 0], sizes = [16, 128], strides = [1, 1]} : vector<18x128xf32> to vector<16x128xf32>
      %143 = arith.addf %141, %142 : vector<16x128xf32>
      %cst_49 = arith.constant 5.000000e-01 : f32
      %144 = vector.broadcast %cst_49 : f32 to vector<16x128xf32>
      %145 = arith.mulf %144, %143 : vector<16x128xf32>
      %146 = vector.extract_strided_slice %124 {offsets = [1, 0], sizes = [16, 128], strides = [1, 1]} : vector<18x128xf32> to vector<16x128xf32>
      %147 = arith.addf %145, %146 : vector<16x128xf32>
      %148 = tpu.iota {dimensions = array<i32: 1>} : vector<16x128xi32>
      %c1_i32_50 = arith.constant 1 : i32
      %149 = tpu.dynamic_rotate %147 by %c1_i32_50 dim 1 : vector<16x128xf32>, i32 -> vector<16x128xf32>
      %c127_i32_51 = arith.constant 127 : i32
      %150 = tpu.dynamic_rotate %147 by %c127_i32_51 dim 1 : vector<16x128xf32>, i32 -> vector<16x128xf32>
      %c0_i32_52 = arith.constant 0 : i32
      %151 = vector.broadcast %c0_i32_52 : i32 to vector<16x128xi32>
      %152 = arith.cmpi eq, %148, %151 : vector<16x128xi32>
      %153 = arith.select %152, %150, %149 : vector<16x128xi1>, vector<16x128xf32>
      %c127_i32_53 = arith.constant 127 : i32
      %154 = vector.broadcast %c127_i32_53 : i32 to vector<16x128xi32>
      %155 = arith.cmpi eq, %148, %154 : vector<16x128xi32>
      %156 = arith.select %155, %149, %150 : vector<16x128xi1>, vector<16x128xf32>
      %157 = arith.subf %156, %153 : vector<16x128xf32>
      %158 = arith.mulf %140, %140 : vector<16x128xf32>
      %159 = arith.mulf %157, %157 : vector<16x128xf32>
      %160 = arith.addf %158, %159 : vector<16x128xf32>
      %cst_54 = arith.constant 9.99999996E-13 : f32
      %161 = vector.broadcast %cst_54 : f32 to vector<16x128xf32>
      %162 = arith.addf %160, %161 : vector<16x128xf32>
      %163 = math.sqrt %162 : vector<16x128xf32>
      %cst_55 = arith.constant 0.00787401571 : f32
      %164 = vector.broadcast %cst_55 : f32 to vector<16x128xf32>
      %165 = arith.mulf %164, %117 : vector<16x128xf32>
      %cst_56 = arith.constant 0.0322580636 : f32
      %166 = vector.broadcast %cst_56 : f32 to vector<16x128xf32>
      %167 = arith.mulf %166, %163 : vector<16x128xf32>
      %168 = arith.addf %165, %167 : vector<16x128xf32>
      %cst_57 = arith.constant 5.000000e-01 : f32
      %169 = vector.broadcast %cst_57 : f32 to vector<16x128xf32>
      %170 = arith.mulf %169, %168 : vector<16x128xf32>
      %171 = arith.index_cast %67 : i32 to index
      %c0_58 = arith.constant 0 : index
      %172 = vector.load %arg6[%171, %c0_58] : memref<32x128xf32, #tpu.memory_space<vmem>>, vector<16x128xf32>
      tpu.vector_store %arg6[%171, %c0_58], %170 {strides = array<i32>} : memref<32x128xf32, #tpu.memory_space<vmem>>, vector<16x128xf32>,
    } else {
    }
    %c1_i32 = arith.constant 1 : i32
    %63 = arith.cmpi eq, %arg0, %c1_i32 : i32
    %64 = arith.extui %63 : i1 to i32
    %c0_i32_21 = arith.constant 0 : i32
    %65 = arith.cmpi ne, %64, %c0_i32_21 : i32
    scf.if %65 {
      %c15 = arith.constant 15 : index
      %c0_22 = arith.constant 0 : index
      %66 = vector.load %arg3[%c15, %c0_22] : memref<32x128xf32, #tpu.memory_space<vmem>>, vector<1x128xf32>
      %c16 = arith.constant 16 : index
      %c0_23 = arith.constant 0 : index
      %67 = vector.load %arg3[%c16, %c0_23] : memref<32x128xf32, #tpu.memory_space<vmem>>, vector<16x128xf32>
      %c30 = arith.constant 30 : index
      %c0_24 = arith.constant 0 : index
      %68 = vector.load %arg3[%c30, %c0_24] : memref<32x128xf32, #tpu.memory_space<vmem>>, vector<1x128xf32>
      %69 = tpu.concatenate %66, %67, %68 in 0 : vector<1x128xf32>, vector<16x128xf32>, vector<1x128xf32> -> vector<18x128xf32>
      %70 = tpu.iota {dimensions = array<i32: 1>} : vector<18x128xi32>
      %c1_i32_25 = arith.constant 1 : i32
      %71 = tpu.dynamic_rotate %69 by %c1_i32_25 dim 1 : vector<18x128xf32>, i32 -> vector<18x128xf32>
      %c127_i32 = arith.constant 127 : i32
      %72 = tpu.dynamic_rotate %69 by %c127_i32 dim 1 : vector<18x128xf32>, i32 -> vector<18x128xf32>
      %c0_i32_26 = arith.constant 0 : i32
      %73 = vector.broadcast %c0_i32_26 : i32 to vector<18x128xi32>
      %74 = arith.cmpi eq, %70, %73 : vector<18x128xi32>
      %75 = arith.select %74, %72, %71 : vector<18x128xi1>, vector<18x128xf32>
      %c127_i32_27 = arith.constant 127 : i32
      %76 = vector.broadcast %c127_i32_27 : i32 to vector<18x128xi32>
      %77 = arith.cmpi eq, %70, %76 : vector<18x128xi32>
      %78 = arith.select %77, %71, %72 : vector<18x128xi1>, vector<18x128xf32>
      %79 = arith.addf %75, %78 : vector<18x128xf32>
      %cst_28 = arith.constant 5.000000e-01 : f32
      %80 = vector.broadcast %cst_28 : f32 to vector<18x128xf32>
      %81 = arith.mulf %80, %79 : vector<18x128xf32>
      %82 = arith.addf %81, %69 : vector<18x128xf32>
      %83 = vector.extract_strided_slice %82 {offsets = [2, 0], sizes = [16, 128], strides = [1, 1]} : vector<18x128xf32> to vector<16x128xf32>
      %84 = vector.extract_strided_slice %82 {offsets = [0, 0], sizes = [16, 128], strides = [1, 1]} : vector<18x128xf32> to vector<16x128xf32>
      %85 = arith.subf %83, %84 : vector<16x128xf32>
      %86 = vector.extract_strided_slice %69 {offsets = [0, 0], sizes = [16, 128], strides = [1, 1]} : vector<18x128xf32> to vector<16x128xf32>
      %87 = vector.extract_strided_slice %69 {offsets = [2, 0], sizes = [16, 128], strides = [1, 1]} : vector<18x128xf32> to vector<16x128xf32>
      %88 = arith.addf %86, %87 : vector<16x128xf32>
      %cst_29 = arith.constant 5.000000e-01 : f32
      %89 = vector.broadcast %cst_29 : f32 to vector<16x128xf32>
      %90 = arith.mulf %89, %88 : vector<16x128xf32>
      %91 = vector.extract_strided_slice %69 {offsets = [1, 0], sizes = [16, 128], strides = [1, 1]} : vector<18x128xf32> to vector<16x128xf32>
      %92 = arith.addf %90, %91 : vector<16x128xf32>
      %93 = tpu.iota {dimensions = array<i32: 1>} : vector<16x128xi32>
      %c1_i32_30 = arith.constant 1 : i32
      %94 = tpu.dynamic_rotate %92 by %c1_i32_30 dim 1 : vector<16x128xf32>, i32 -> vector<16x128xf32>
      %c127_i32_31 = arith.constant 127 : i32
      %95 = tpu.dynamic_rotate %92 by %c127_i32_31 dim 1 : vector<16x128xf32>, i32 -> vector<16x128xf32>
      %c0_i32_32 = arith.constant 0 : i32
      %96 = vector.broadcast %c0_i32_32 : i32 to vector<16x128xi32>
      %97 = arith.cmpi eq, %93, %96 : vector<16x128xi32>
      %98 = arith.select %97, %95, %94 : vector<16x128xi1>, vector<16x128xf32>
      %c127_i32_33 = arith.constant 127 : i32
      %99 = vector.broadcast %c127_i32_33 : i32 to vector<16x128xi32>
      %100 = arith.cmpi eq, %93, %99 : vector<16x128xi32>
      %101 = arith.select %100, %94, %95 : vector<16x128xi1>, vector<16x128xf32>
      %102 = arith.subf %101, %98 : vector<16x128xf32>
      %103 = arith.mulf %85, %85 : vector<16x128xf32>
      %104 = arith.mulf %102, %102 : vector<16x128xf32>
      %105 = arith.addf %103, %104 : vector<16x128xf32>
      %cst_34 = arith.constant 9.99999996E-13 : f32
      %106 = vector.broadcast %cst_34 : f32 to vector<16x128xf32>
      %107 = arith.addf %105, %106 : vector<16x128xf32>
      %108 = math.sqrt %107 : vector<16x128xf32>
      %c15_35 = arith.constant 15 : index
      %c0_36 = arith.constant 0 : index
      %109 = vector.load %arg4[%c15_35, %c0_36] : memref<32x128xf32, #tpu.memory_space<vmem>>, vector<1x128xf32>
      %c16_37 = arith.constant 16 : index
      %c0_38 = arith.constant 0 : index
      %110 = vector.load %arg4[%c16_37, %c0_38] : memref<32x128xf32, #tpu.memory_space<vmem>>, vector<16x128xf32>
      %c30_39 = arith.constant 30 : index
      %c0_40 = arith.constant 0 : index
      %111 = vector.load %arg4[%c30_39, %c0_40] : memref<32x128xf32, #tpu.memory_space<vmem>>, vector<1x128xf32>
      %112 = tpu.concatenate %109, %110, %111 in 0 : vector<1x128xf32>, vector<16x128xf32>, vector<1x128xf32> -> vector<18x128xf32>
      %113 = tpu.iota {dimensions = array<i32: 1>} : vector<18x128xi32>
      %c1_i32_41 = arith.constant 1 : i32
      %114 = tpu.dynamic_rotate %112 by %c1_i32_41 dim 1 : vector<18x128xf32>, i32 -> vector<18x128xf32>
      %c127_i32_42 = arith.constant 127 : i32
      %115 = tpu.dynamic_rotate %112 by %c127_i32_42 dim 1 : vector<18x128xf32>, i32 -> vector<18x128xf32>
      %c0_i32_43 = arith.constant 0 : i32
      %116 = vector.broadcast %c0_i32_43 : i32 to vector<18x128xi32>
      %117 = arith.cmpi eq, %113, %116 : vector<18x128xi32>
      %118 = arith.select %117, %115, %114 : vector<18x128xi1>, vector<18x128xf32>
      %c127_i32_44 = arith.constant 127 : i32
      %119 = vector.broadcast %c127_i32_44 : i32 to vector<18x128xi32>
      %120 = arith.cmpi eq, %113, %119 : vector<18x128xi32>
      %121 = arith.select %120, %114, %115 : vector<18x128xi1>, vector<18x128xf32>
      %122 = arith.addf %118, %121 : vector<18x128xf32>
      %cst_45 = arith.constant 5.000000e-01 : f32
      %123 = vector.broadcast %cst_45 : f32 to vector<18x128xf32>
      %124 = arith.mulf %123, %122 : vector<18x128xf32>
      %125 = arith.addf %124, %112 : vector<18x128xf32>
      %126 = vector.extract_strided_slice %125 {offsets = [2, 0], sizes = [16, 128], strides = [1, 1]} : vector<18x128xf32> to vector<16x128xf32>
      %127 = vector.extract_strided_slice %125 {offsets = [0, 0], sizes = [16, 128], strides = [1, 1]} : vector<18x128xf32> to vector<16x128xf32>
      %128 = arith.subf %126, %127 : vector<16x128xf32>
      %129 = vector.extract_strided_slice %112 {offsets = [0, 0], sizes = [16, 128], strides = [1, 1]} : vector<18x128xf32> to vector<16x128xf32>
      %130 = vector.extract_strided_slice %112 {offsets = [2, 0], sizes = [16, 128], strides = [1, 1]} : vector<18x128xf32> to vector<16x128xf32>
      %131 = arith.addf %129, %130 : vector<16x128xf32>
      %cst_46 = arith.constant 5.000000e-01 : f32
      %132 = vector.broadcast %cst_46 : f32 to vector<16x128xf32>
      %133 = arith.mulf %132, %131 : vector<16x128xf32>
      %134 = vector.extract_strided_slice %112 {offsets = [1, 0], sizes = [16, 128], strides = [1, 1]} : vector<18x128xf32> to vector<16x128xf32>
      %135 = arith.addf %133, %134 : vector<16x128xf32>
      %136 = tpu.iota {dimensions = array<i32: 1>} : vector<16x128xi32>
      %c1_i32_47 = arith.constant 1 : i32
      %137 = tpu.dynamic_rotate %135 by %c1_i32_47 dim 1 : vector<16x128xf32>, i32 -> vector<16x128xf32>
      %c127_i32_48 = arith.constant 127 : i32
      %138 = tpu.dynamic_rotate %135 by %c127_i32_48 dim 1 : vector<16x128xf32>, i32 -> vector<16x128xf32>
      %c0_i32_49 = arith.constant 0 : i32
      %139 = vector.broadcast %c0_i32_49 : i32 to vector<16x128xi32>
      %140 = arith.cmpi eq, %136, %139 : vector<16x128xi32>
      %141 = arith.select %140, %138, %137 : vector<16x128xi1>, vector<16x128xf32>
      %c127_i32_50 = arith.constant 127 : i32
      %142 = vector.broadcast %c127_i32_50 : i32 to vector<16x128xi32>
      %143 = arith.cmpi eq, %136, %142 : vector<16x128xi32>
      %144 = arith.select %143, %137, %138 : vector<16x128xi1>, vector<16x128xf32>
      %145 = arith.subf %144, %141 : vector<16x128xf32>
      %146 = arith.mulf %128, %128 : vector<16x128xf32>
      %147 = arith.mulf %145, %145 : vector<16x128xf32>
      %148 = arith.addf %146, %147 : vector<16x128xf32>
      %cst_51 = arith.constant 9.99999996E-13 : f32
      %149 = vector.broadcast %cst_51 : f32 to vector<16x128xf32>
      %150 = arith.addf %148, %149 : vector<16x128xf32>
      %151 = math.sqrt %150 : vector<16x128xf32>
      %cst_52 = arith.constant 0.00787401571 : f32
      %152 = vector.broadcast %cst_52 : f32 to vector<16x128xf32>
      %153 = arith.mulf %152, %108 : vector<16x128xf32>
      %cst_53 = arith.constant 0.0322580636 : f32
      %154 = vector.broadcast %cst_53 : f32 to vector<16x128xf32>
      %155 = arith.mulf %154, %151 : vector<16x128xf32>
      %156 = arith.addf %153, %155 : vector<16x128xf32>
      %cst_54 = arith.constant 5.000000e-01 : f32
      %157 = vector.broadcast %cst_54 : f32 to vector<16x128xf32>
      %158 = arith.mulf %157, %156 : vector<16x128xf32>
      %c16_55 = arith.constant 16 : index
      %c0_56 = arith.constant 0 : index
      %159 = vector.load %arg6[%c16_55, %c0_56] : memref<32x128xf32, #tpu.memory_space<vmem>>, vector<16x128xf32>
      tpu.vector_store %arg6[%c16_55, %c0_56], %158 {strides = array<i32>} : memref<32x128xf32, #tpu.memory_space<vmem>>, vector<16x128xf32>,
      %c0_57 = arith.constant 0 : index
      %c0_58 = arith.constant 0 : index
      %160 = vector.load %arg6[%c0_57, %c0_58] : memref<32x128xf32, #tpu.memory_space<vmem>>, vector<32x128xf32>
      %cst_59 = arith.constant -3.000000e+38 : f32
      %161 = vector.broadcast %cst_59 : f32 to vector<3x128xf32>
      %cst_60 = arith.constant -3.000000e+38 : f32
      %162 = vector.broadcast %cst_60 : f32 to vector<4x128xf32>
      %163 = tpu.concatenate %161, %160, %162 in 0 : vector<3x128xf32>, vector<32x128xf32>, vector<4x128xf32> -> vector<39x128xf32>
      %164 = vector.extract_strided_slice %163 {offsets = [0, 0], sizes = [38, 128], strides = [1, 1]} : vector<39x128xf32> to vector<38x128xf32>
      %165 = vector.extract_strided_slice %163 {offsets = [1, 0], sizes = [38, 128], strides = [1, 1]} : vector<39x128xf32> to vector<38x128xf32>
      %166 = arith.maximumf %164, %165 : vector<38x128xf32>
      %167 = vector.extract_strided_slice %166 {offsets = [0, 0], sizes = [36, 128], strides = [1, 1]} : vector<38x128xf32> to vector<36x128xf32>
      %168 = vector.extract_strided_slice %166 {offsets = [2, 0], sizes = [36, 128], strides = [1, 1]} : vector<38x128xf32> to vector<36x128xf32>
      %169 = arith.maximumf %167, %168 : vector<36x128xf32>
      %170 = vector.extract_strided_slice %169 {offsets = [0, 0], sizes = [32, 128], strides = [1, 1]} : vector<36x128xf32> to vector<32x128xf32>
      %171 = vector.extract_strided_slice %169 {offsets = [4, 0], sizes = [32, 128], strides = [1, 1]} : vector<36x128xf32> to vector<32x128xf32>
      %172 = arith.maximumf %170, %171 : vector<32x128xf32>
      %cst_61 = arith.constant -3.000000e+38 : f32
      %173 = vector.broadcast %cst_61 : f32 to vector<32x3xf32>
      %cst_62 = arith.constant -3.000000e+38 : f32
      %174 = vector.broadcast %cst_62 : f32 to vector<32x4xf32>
      %175 = tpu.concatenate %173, %172, %174 in 1 : vector<32x3xf32>, vector<32x128xf32>, vector<32x4xf32> -> vector<32x135xf32>
      %176 = vector.extract_strided_slice %175 {offsets = [0, 0], sizes = [32, 134], strides = [1, 1]} : vector<32x135xf32> to vector<32x134xf32>
      %177 = vector.extract_strided_slice %175 {offsets = [0, 1], sizes = [32, 134], strides = [1, 1]} : vector<32x135xf32> to vector<32x134xf32>
      %178 = arith.maximumf %176, %177 : vector<32x134xf32>
      %179 = vector.extract_strided_slice %178 {offsets = [0, 0], sizes = [32, 132], strides = [1, 1]} : vector<32x134xf32> to vector<32x132xf32>
      %180 = vector.extract_strided_slice %178 {offsets = [0, 2], sizes = [32, 132], strides = [1, 1]} : vector<32x134xf32> to vector<32x132xf32>
      %181 = arith.maximumf %179, %180 : vector<32x132xf32>
      %182 = vector.extract_strided_slice %181 {offsets = [0, 0], sizes = [32, 128], strides = [1, 1]} : vector<32x132xf32> to vector<32x128xf32>
      %183 = vector.extract_strided_slice %181 {offsets = [0, 4], sizes = [32, 128], strides = [1, 1]} : vector<32x132xf32> to vector<32x128xf32>
      %184 = arith.maximumf %182, %183 : vector<32x128xf32>
      %185 = vector.shape_cast %184 : vector<32x128xf32> to vector<1x32x128xf32>
      %cst_63 = arith.constant dense<0x7F800000> : vector<1xf32>
      %186 = vector.multi_reduction <minimumf>, %185, %cst_63 [1, 2] : vector<1x32x128xf32> to vector<1xf32>
      %187 = vector.shape_cast %186 : vector<1xf32> to vector<1x1x1xf32>
      %188 = vector.extract %187[0, 0, 0] : f32 from vector<1x1x1xf32>
      %189 = vector.shape_cast %184 : vector<32x128xf32> to vector<1x32x128xf32>
      %cst_64 = arith.constant dense<0xFF800000> : vector<1xf32>
      %190 = vector.multi_reduction <maximumf>, %189, %cst_64 [1, 2] : vector<1x32x128xf32> to vector<1xf32>
      %191 = vector.shape_cast %190 : vector<1xf32> to vector<1x1x1xf32>
      %192 = vector.extract %191[0, 0, 0] : f32 from vector<1x1x1xf32>
      %193 = arith.subf %192, %188 : f32
      %cst_65 = arith.constant 2.500000e-02 : f32
      %194 = arith.mulf %cst_65, %193 : f32
      %195 = arith.addf %188, %194 : f32
      %196 = vector.broadcast %195 : f32 to vector<32x128xf32>
      %197 = arith.cmpf ogt, %184, %196 : vector<32x128xf32>
      %198 = arith.extui %197 : vector<32x128xi1> to vector<32x128xi32>
      %199 = arith.trunci %198 : vector<32x128xi32> to vector<32x128xi8>
      %c0_66 = arith.constant 0 : index
      %c0_67 = arith.constant 0 : index
      %200 = vector.load %arg5[%c0_66, %c0_67] : memref<32x128xi8, #tpu.memory_space<vmem>>, vector<32x128xi8>
      tpu.vector_store %arg5[%c0_66, %c0_67], %199 {strides = array<i32>} : memref<32x128xi8, #tpu.memory_space<vmem>>, vector<32x128xi8>,
    } else {
    }
    return
  }
  func.func @transform_0(%arg0: i32) -> (i32, i32, i32) {
    %c0_i32 = arith.constant 0 : i32
    %c0_i32_0 = arith.constant 0 : i32
    %c0_i32_1 = arith.constant 0 : i32
    return %c0_i32, %arg0, %c0_i32_0 : i32, i32, i32
  }
  func.func @transform_1(%arg0: i32) -> (i32, i32, i32) {
    %c0_i32 = arith.constant 0 : i32
    %c0_i32_0 = arith.constant 0 : i32
    %c0_i32_1 = arith.constant 0 : i32
    return %c0_i32, %arg0, %c0_i32_0 : i32, i32, i32
  }
  func.func @transform_2(%arg0: i32) -> (i32, i32) {
    %c0_i32 = arith.constant 0 : i32
    %c0_i32_0 = arith.constant 0 : i32
    %c0_i32_1 = arith.constant 0 : i32
    return %c0_i32, %c0_i32_0 : i32, i32
  }
  func.func @transform_3(%arg0: i32) -> (i32, i32) {
    %c0_i32 = arith.constant 0 : i32
    %c0_i32_0 = arith.constant 0 : i32
    %c0_i32_1 = arith.constant 0 : i32
    return %c0_i32, %c0_i32_0 : i32, i32
  }
  func.func @transform_4(%arg0: i32) -> (i32, i32) {
    %c0_i32 = arith.constant 0 : i32
    %c0_i32_0 = arith.constant 0 : i32
    %c0_i32_1 = arith.constant 0 : i32
    return %c0_i32, %c0_i32_0 : i32, i32
  }
}

</mosaic_0001>

<bundles_post_ra>
// kernel: tpu_custom_call.1
= control target key start
LH: loop header
LB: loop body
LE: loop exit
PB: predicated region body
PF: predicated region fallthrough
CT: control target
= control target key end

     0   :  { %10 = vsyncpa [#allocation4], 0  ;;  %s2199_s0 = inlined_call_operand.hbm [shape: bf16[3,32,128], index: 0, kind: input, shape index: {}]   ;;  %s2200_s1 = inlined_call_operand.hbm [shape: bf16[3,32,128], index: 1, kind: input, shape index: {}]   ;;  %s2201_s2 = inlined_call_operand.hbm [shape: f32[32,128], index: 2, kind: output, shape index: {0}]   ;;  %s2202_s3 = inlined_call_operand.hbm [shape: f32[32,128], index: 3, kind: output, shape index: {1}]   ;;  %s2203_s4 = inlined_call_operand.hbm [shape: s8[32,128], index: 4, kind: output, shape index: {2}]  }
   0x1   :  { %12 = vsyncpa [#allocation4 + $0x1], 0 }
   0x2   :  { %13 = vsyncpa [#allocation7], 0 }
   0x3   :  { %15 = vsyncpa [#allocation7 + $0x1], 0 }
   0x4   :  { %16 = vsyncpa [#allocation5], 0 }
   0x5   :  { %17 = vsyncpa [#allocation10], 0  ;;  %s1743_s15 = smov 0   ;;  %s1745_s16 = smov 0  }
   0x6   :  { %s1747_s17 = smov 0   ;;  %s1749_s18 = smov 0  }
   0x7 LB: > { %s1762_s19 = sadd.s32 4294967295, %s1691_s18   ;;  %s1765_s20 = sadd.s32 1, %s1691_s18   ;;  %s1691_s18 = sphi %s1749_s18, %s2209_s18   ;;  %s1687_s17 = sphi %s1747_s17, %s2208_s17   ;;  %s1683_s16 = sphi %s1745_s16, %s2207_s16   ;;  %s1679_s15 = sphi %s1743_s15, %s2206_s15  }
   0x8   : > { %s27_s21 = ssub.s32 %s1691_s18, %s1765_s20  ;;  %s30_s22 = sadd.s32 1, %s1687_s17 }
   0x9   : > { %p28_p0 = scmp.eq.s32.totalorder %s27_s21, 0  ;;  %p37_p1 = scmp.ne.s32.totalorder %s1687_s17, %s1683_s16 }
   0xa   : > { %p38_p2 = scmp.eq.s32.totalorder %s1691_s18, 0  ;;  %p43_p3 = scmp.ne.s32.totalorder %s1683_s16, %s1679_s15 }
   0xb   : > { %s1775_s23 = scalar_select %p28_p0, %s1687_s17, %s30_s22  }
   0xc   : > { %p1777_p4 = por %p38_p2, %p37_p1  ;;  %p44_p5 = scmp.eq.s32.totalorder %s1762_s19, 0 }
   0xd   : > { %p1391_p7 = scmp.ge.s32.totalorder %s1691_s18, 2 }
   0xe   : > { %p1782_p6 = por %p44_p5, %p43_p3 }
   0xf   : > { %152 = sbr.rel (%p1391_p7) target bundleno = 46 (0x2e), region = 16 }
  0x14   : > { %s1788_s26 = sand.u32 1, %s1687_s17   ;;  %s1419_s28 = sshll.u32 %s1691_s18, 7 }
  0x15   : > { %s1449_s27 = smul.u32 24, %s1788_s26  ;;  %s1693_s29 = smov 256  }
  0x16   : > { %1457 = sst [smem:[#allocation13]] (%p1777_p4), %s1693_s29  ;;  %s166_s7 = scalar_lea.hbm %s2199_s0, %s1419_s28 }
  0x17   : > { %s1456_s30 = scalar_select %p1777_p4, [#allocation0], [#allocation16] }
  0x18   : > { %s160_s9 = scalar_lea.vmem [#allocation3], %s1449_s27  ;;  %s1694_s11 = smov 128  }
  0x19   : > { %s171_s8 = sld [smem:[%s1456_s30]]   ;;  %s179_s10 = sshll.u32 %s160_s9, 4  ;;  %s180_s10 = int_to_ptr.vmem [resolvable:$true] %s179_s10 }
  0x1a   : > { %1458 = sst [smem:[#allocation13 + $0x1]] (%p1777_p4), %s1694_s11  ;;  %s1695_s12 = smov 2  }
  0x1b   : > { %1459 = sst [smem:[#allocation13 + $0x2]] (%p1777_p4), %s1695_s12  ;;  %s1696_s13 = smov 64  }
  0x1c   : > { %1460 = sst [smem:[#allocation13 + $0x3]] (%p1777_p4), %s1696_s13  ;;  %s1697_s14 = smov 4  }
  0x1d   : > { %1461 = sst [smem:[#allocation13 + $0x4]] (%p1777_p4), %s1696_s13  ;;  %s157_s22 = scalar_lea.sflag [#allocation4], %s1788_s26 }
  0x1e   : > { %1462 = sst [smem:[#allocation13 + $0x5]] (%p1777_p4), %s1697_s14  ;;  %s1698_s29 = smov 131072  }
  0x1f   : > { %s1394_s15 = sshll.u32 %s171_s8, 26 }
  0x20   : > { %s1395_s21 = sadd.s32 134217728, %s1394_s15 }
  0x21   : > { %1463 = dma.general (%p1777_p4), %s166_s7, 384, %s180_s10, %s157_s22, %s1698_s29, [#allocation13], %s1395_s21, 0  }
  0x22   : > { %s212_s6 = scalar_lea.hbm %s2200_s1, %s1419_s28  ;;  %s206_s11 = scalar_lea.vmem [#allocation6], %s1449_s27 }
  0x23   : > { %s1464_s9 = scalar_select %p1777_p4, [#allocation0], [#allocation17] }
  0x24   : > { %s225_s8 = sshll.u32 %s206_s11, 4  ;;  %s1699_s13 = smov 256   ;;  %s226_s8 = int_to_ptr.vmem [resolvable:$true] %s225_s8 }
  0x25   : > { %s217_s12 = sld [smem:[%s1464_s9]]   ;;  %s1700_s7 = smov 128  }
  0x26   : > { %1465 = sst [smem:[#allocation15]] (%p1777_p4), %s1699_s13  ;;  %s1701_s10 = smov 2  }
  0x27   : > { %1466 = sst [smem:[#allocation15 + $0x1]] (%p1777_p4), %s1700_s7  ;;  %s1702_s14 = smov 64  }
  0x28   : > { %1467 = sst [smem:[#allocation15 + $0x2]] (%p1777_p4), %s1701_s10  ;;  %s1703_s28 = smov 4  }
  0x29   : > { %1468 = sst [smem:[#allocation15 + $0x3]] (%p1777_p4), %s1702_s14  ;;  %s203_s21 = scalar_lea.sflag [#allocation7], %s1788_s26 }
  0x2a   : > { %1469 = sst [smem:[#allocation15 + $0x4]] (%p1777_p4), %s1702_s14  ;;  %s1704_s22 = smov 131072  }
  0x2b   : > { %s1398_s27 = sshll.u32 %s217_s12, 26  ;;  %1470 = sst [smem:[#allocation15 + $0x5]] (%p1777_p4), %s1703_s28 }
  0x2c   : > { %s1399_s15 = sadd.s32 134217728, %s1398_s27 }
  0x2d   : > { %1471 = dma.general (%p1777_p4), %s212_s6, 384, %s226_s8, %s203_s21, %s1704_s22, [#allocation15], %s1399_s15, 0  }
  0x2e PF: > { %p1400_p8 = scmp.ge.s32.totalorder %s1691_s18, 1  ;;  %p246_p9 = scmp.lt.s32.totalorder %s1691_s18, 3 }
  0x30   : > { %p247_p10 = pnand %p1400_p8, %p246_p9 }
  0x31   : > { %s252_s29 = sand.u32 (!%p247_p10), 1, %s1683_s16  }
  0x32   : > { %250 = sbr.rel (%p247_p10) target bundleno = 1243 (0x4db), region = 28  ;;  %s253_s5 = scalar_lea.sflag (!%p247_p10), [#allocation4], %s252_s29 }
  0x33   : > { %s1451_s30 = smul.u32 (!%p247_p10), 24, %s252_s29 }
  0x35   : > { %s256_s9 = scalar_lea.vmem (!%p247_p10), [#allocation3], %s1451_s30 }
  0x37   : > { %1662 = dma.done.wait (%p1782_p6), %s253_s5, 384  }
  0x38   : > { %1664 = vsyncadd (%p1782_p6), %s253_s5, 4294966912  ;;  %s262_s24 = scalar_lea.sflag [#allocation7], %s252_s29  ;;  %s265_s26 = scalar_lea.vmem [#allocation6], %s1451_s30 }
  0x39   : > { %1666 = dma.done.wait (%p1782_p6), %s262_s24, 384  }
  0x3a   : > { %1668 = vsyncadd (%p1782_p6), %s262_s24, 4294966912  ;;  %v1422_v0 = vld [vmem:[%s256_s9] sm:$0xff]   ;;  %v1445_v1 = vld [vmem:[%s256_s9 + $0x8] sm:$0xff]   ;;  %s1401_s18 = sshll.u32 %s1762_s19, 4  ;;  %p1402_p11 = scmp.le.s32.totalorder %s1762_s19, 0 }
  0x3b   : > { %v1423_v2 = vunpack.c.l.bf16 %v1422_v0  ;;  %v1427_v3 = vunpack.c.l.bf16 %v1445_v1  ;;  %v1446_v4 = vld [vmem:[%s256_s9 + $0x10] sm:$0xff]   ;;  %v1447_v6 = vld [vmem:[%s265_s26 + $0x8] sm:$0xff]   ;;  %v1424_v7 = vunpack.c.h.bf16 %v1422_v0  ;;  %v1448_v10 = vld [vmem:[%s265_s26 + $0x10] sm:$0xff]   ;;  %v1428_v12 = vunpack.c.h.bf16 %v1445_v1  ;;  %s367_s25 = scalar_lea.vmem [#allocation8], %s1401_s18  ;;  %s370_s6 = scalar_lea.vmem [#allocation9], %s1401_s18 }
  0x3c   : > { %v1434_v5 = vld [vmem:[%s265_s26] sm:$0xff]   ;;  %v1439_v9 = vunpack.c.l.bf16 %v1447_v6  ;;  %v1431_v13 = vunpack.c.l.bf16 %v1446_v4  ;;  %v1440_v18 = vunpack.c.h.bf16 %v1447_v6  ;;  %v1443_v20 = vunpack.c.l.bf16 %v1448_v10  ;;  %s1403_s11 = sadd.s32 (!%p1402_p11), 4294967295, %s1762_s19  ;;  %s1705_s10 = smov (!%p1402_p11), 127  }
  0x3d   : > { %v1435_v8 = vunpack.c.l.bf16 %v1434_v5  ;;  %v318_v11 = vmul.f32 -0.25, %v1423_v2  ;;  %v1436_v15 = vunpack.c.h.bf16 %v1434_v5  ;;  %v334_v17 = vmul.f32 -0.08333333, %v1427_v3  ;;  %s1846_s8 = sshll.u32 (!%p1402_p11), %s1403_s11, 4  ;;  %p379_p12 = scmp.gt.s32.totalorder (!%p1402_p11), %s1403_s11, 0 }
  0x3e   : > { %v319_v19 = vmul.f32 -0.25, %v1424_v7  ;;  %v1432_v21 = vunpack.c.h.bf16 %v1446_v4  ;;  %v338_v24 = vmul.f32 0.4166667, %v1439_v9  ;;  %v335_v26 = vmul.f32 -0.08333333, %v1428_v12  ;;  %s385_s12 = scalar_lea.vmem (!%p1402_p11), [#allocation8], %s1846_s8 }
  0x3f   : > { %v322_v14 = vmul.f32 0.25, %v1435_v8  ;;  %v320_v16 = vadd.f32 0.5, %v318_v11  ;;  %v323_v22 = vmul.f32 0.25, %v1436_v15  ;;  %v350_v27 = vmul.f32 0.08333334, %v1431_v13  ;;  %s527_s13 = scalar_lea.vmem (!%p1402_p11), [#allocation9], %s1846_s8 }
  0x40   : > { %v321_v25 = vadd.f32 0.5, %v319_v19  ;;  %v326_v28 = vmul.f32 -0.16666666, %v1423_v2  ;;  %v330_v29 = vmul.f32 0.3333333, %v1435_v8  ;;  %v1444_v31 = vunpack.c.h.bf16 %v1448_v10  ;;  %s1405_s7 = sadd.s32 (!%p1402_p11), 4294967295, %s1846_s8 }
  0x41   : > { %v324_v23 = vadd.f32 %v322_v14, %v320_v16  ;;  %v339_v33 = vmul.f32 0.4166667, %v1440_v18  ;;  %v342_v35 = vmul.f32 0.0, %v1427_v3  ;;  %v327_v36 = vmul.f32 -0.16666666, %v1424_v7  ;;  %s1706_s14 = smov (!%p1402_p11), 1  }
  0x42   : > { %v325_v32 = vadd.f32 %v323_v22, %v321_v25  ;;  %v328_v34 = vadd.f32 -0.5, %v326_v28  ;;  %v331_v37 = vmul.f32 0.3333333, %v1436_v15  ;;  %v354_v39 = vmul.f32 0.5833333, %v1443_v20  ;;  %s671_s15 = scalar_lea.vmem (!%p1402_p11), [#allocation2], %s1846_s8 }
  0x43   : > { %v336_v30 = vadd.f32 %v334_v17, %v324_v23  ;;  %v351_v41 = vmul.f32 0.08333334, %v1432_v21  ;;  %v346_v43 = vmul.f32 0.5, %v1439_v9  ;;  %v329_v44 = vadd.f32 -0.5, %v327_v36 }
  0x44   : > { %v337_v40 = vadd.f32 %v335_v26, %v325_v32  ;;  %v332_v42 = vadd.f32 %v330_v29, %v328_v34  ;;  %v343_v45 = vmul.f32 0.0, %v1428_v12  ;;  %v355_v48 = vmul.f32 0.5833333, %v1444_v31 }
  0x45   : > { %v340_v38 = vadd.f32 %v338_v24, %v336_v30  ;;  %v358_v50 = vmul.f32 0.16666666, %v1431_v13  ;;  %v333_v51 = vadd.f32 %v331_v37, %v329_v44  ;;  %v347_v52 = vmul.f32 0.5, %v1440_v18 }
  0x46   : > { %v341_v47 = vadd.f32 %v339_v33, %v337_v40  ;;  %v344_v49 = vadd.f32 %v342_v35, %v332_v42  ;;  %v362_v56 = vmul.f32 0.6666667, %v1443_v20  ;;  %v359_v58 = vmul.f32 0.16666666, %v1432_v21 }
  0x47   : > { %v352_v46 = vadd.f32 %v350_v27, %v340_v38  ;;  %v345_v57 = vadd.f32 %v343_v45, %v333_v51  ;;  %v363_v62 = vmul.f32 0.6666667, %v1444_v31 }
  0x48   : > { %v353_v54 = vadd.f32 %v351_v41, %v341_v47  ;;  %v348_v55 = vadd.f32 %v346_v43, %v344_v49 }
  0x49   : > { %v356_v53 = vadd.f32 %v354_v39, %v352_v46  ;;  %v349_v61 = vadd.f32 %v347_v52, %v345_v57 }
  0x4a   : > { %v357_v59 = vadd.f32 %v355_v48, %v353_v54  ;;  %v360_v60 = vadd.f32 %v358_v50, %v348_v55 }
  0x4b   : > { %368 = vst [vmem:[%s367_s25] sm:$0xff] %v356_v53  ;;  %v361_v0 = vadd.f32 %v359_v58, %v349_v61  ;;  %376 = sbr.rel (%p1402_p11) target bundleno = 276 (0x114), region = 40 }
  0x4c   : > { %369 = vst [vmem:[%s367_s25 + $0x8] sm:$0xff] %v357_v59  ;;  %v364_v63 = vadd.f32 %v362_v56, %v360_v60 }
  0x4d   : > { %v365_v1 = vadd.f32 %v363_v62, %v361_v0 }
  0x4e   : > { %371 = vst [vmem:[%s370_s6] sm:$0xff] %v364_v63 }
  0x4f   : > { %372 = vst [vmem:[%s370_s6 + $0x8] sm:$0xff] %v365_v1 }
  0x50   : > { %vm392_vm0 = vcmask 1040384   ;;  %s2211_s7 = smov (!%p379_p12, %s1405_s7), 1  ;;  %vm449_vm1 = vcmask 1045504   ;;  %vm461_vm2 = vcmask 1046528   ;;  %v404_v55 = vlaneseq }
  0x51   : > { %s383_s27 = scalar_lea.vmem [#allocation8], %s2211_s7  ;;  %s525_s28 = scalar_lea.vmem [#allocation9], %s2211_s7  ;;  %vm437_vm5 = vcmask 1041408  }
  0x52   : > { %v1925_v57 = vand.u32 127, %v404_v55 }
  0x53   : > { %v386_v2 = vld [vmem:[%s385_s12] sm:$0xff]  ;;  %v387_v3 = vld [vmem:[%s385_s12 + $0x8] sm:$0xff]  ;;  %v1407_v4 = vld [vmem:[%s385_s12 + $0x10] sm:$0x1] }
  0x54   : > { %v393_v5 = vrot.slane %v386_v2, 7  ;;  %v394_v6 = vrot.slane %v387_v3, 7  ;;  %v400_v11 = vrot.slane %v1407_v4, 7  ;;  %v384_v14 = vld [vmem:[%s383_s27] sm:$0x1]  ;;  %vm418_vm3 = vcmp.eq.s32.totalorder %v1925_v57, 0 }
  0x55   : > { %vm422_vm4 = vcmp.eq.s32.totalorder %v1925_v57, 127 }
  0x56   : > { %v528_v7 = vld [vmem:[%s527_s13] sm:$0xff]  ;;  %v529_v8 = vld [vmem:[%s527_s13 + $0x8] sm:$0xff]  ;;  %v1852_v12 = vsel %vm392_vm0, %v393_v5, %v394_v6  ;;  %v1862_v15 = vsel %vm392_vm0, %v384_v14, %v393_v5  ;;  %v1865_v17 = vsel %vm392_vm0, %v394_v6, %v400_v11  ;;  %v1409_v18 = vld [vmem:[%s527_s13 + $0x10] sm:$0x1] }
  0x57   : > { %v534_v9 = vrot.slane %v528_v7, 7  ;;  %v535_v10 = vrot.slane %v529_v8, 7  ;;  %414 = vrot.lane.b32.xlu1 %v1852_v12, %s1705_s10  ;;  %408 = vrot.lane.b32.xlu0 %v1852_v12, %s1706_s14  ;;  %v526_v16 = vld [vmem:[%s525_s28] sm:$0x1]  ;;  %v451_v20 = vrot.slane %v1852_v12, 2  ;;  %v453_v21 = vrot.slane %v1865_v17, 2 }
  0x58   : > { %v450_v22 = vrot.slane %v1862_v15, 2  ;;  %v541_v23 = vrot.slane %v1409_v18, 7  ;;  %v463_v31 = vrot.slane %v1852_v12, 1  ;;  %v465_v32 = vrot.slane %v1865_v17, 1 }
  0x59   : > { %v1859_v13 = vsel %vm392_vm0, %v534_v9, %v535_v10  ;;  %v1872_v19 = vsel %vm392_vm0, %v526_v16, %v534_v9  ;;  %v454_v24 = vsel %vm449_vm1, %v451_v20, %v453_v21  ;;  %v462_v33 = vrot.slane %v1862_v15, 1 }
  0x5a   : > { %v452_v25 = vsel %vm449_vm1, %v450_v22, %v451_v20  ;;  %v1884_v26 = vsel %vm392_vm0, %v535_v10, %v541_v23  ;;  %v458_v27 = vadd.f32 %v454_v24, %v1852_v12  ;;  %v586_v29 = vrot.slane %v1859_v13, 2 }
  0x5b   : > { %547 = vrot.lane.b32.xlu1 %v1859_v13, %s1706_s14  ;;  %406 = vrot.lane.b32.xlu0 %v1862_v15, %s1706_s14  ;;  %v457_v28 = vadd.f32 %v452_v25, %v1862_v15  ;;  %v588_v30 = vrot.slane %v1884_v26, 2  ;;  %v585_v34 = vrot.slane %v1872_v19, 2  ;;  %v466_v38 = vsel %vm461_vm2, %v463_v31, %v465_v32 }
  0x5c   : > { %v460_v35 = vmul.f32 0.5, %v458_v27  ;;  %v464_v39 = vsel %vm461_vm2, %v462_v33, %v463_v31  ;;  %v597_v45 = vrot.slane %v1859_v13, 1  ;;  %v599_v46 = vrot.slane %v1884_v26, 1 }
  0x5d   : > { %v459_v36 = vmul.f32 0.5, %v457_v28  ;;  %v589_v37 = vsel %vm449_vm1, %v586_v29, %v588_v30  ;;  %v587_v40 = vsel %vm449_vm1, %v585_v34, %v586_v29  ;;  %v596_v47 = vrot.slane %v1872_v19, 1 }
  0x5e   : > { %v593_v41 = vadd.f32 %v589_v37, %v1859_v13  ;;  %v470_v42 = vadd.f32 %v466_v38, %v460_v35  ;;  %v592_v44 = vadd.f32 %v587_v40, %v1872_v19  ;;  %v600_v50 = vsel %vm461_vm2, %v597_v45, %v599_v46 }
  0x5f   : > { %412 = vrot.lane.b32.xlu1 %v1862_v15, %s1705_s10  ;;  %545 = vrot.lane.b32.xlu0 %v1872_v19, %s1706_s14  ;;  %v469_v43 = vadd.f32 %v464_v39, %v459_v36  ;;  %v598_v51 = vsel %vm461_vm2, %v596_v47, %v597_v45 }
  0x60   : > { %v595_v48 = vmul.f32 0.5, %v593_v41  ;;  %v594_v49 = vmul.f32 0.5, %v592_v44 }
  0x62   : > { %v604_v52 = vadd.f32 %v600_v50, %v595_v48  ;;  %v603_v53 = vadd.f32 %v598_v51, %v594_v49 }
  0x63   : > { %553 = vrot.lane.b32.xlu1 %v1859_v13, %s1705_s10  ;;  %551 = vrot.lane.b32.xlu0 %v1872_v19, %s1705_s10 }
  0x67   : > { %416 = vrot.lane.b32.xlu1 %v1865_v17, %s1705_s10  ;;  %410 = vrot.lane.b32.xlu0 %v1865_v17, %s1706_s14 }
  0x6b   : > { %555 = vrot.lane.b32.xlu1 %v1884_v26, %s1705_s10  ;;  %549 = vrot.lane.b32.xlu0 %v1884_v26, %s1706_s14 }
  0x6f   : > { %473 = vrot.lane.b32.xlu1 %v470_v42, %s1706_s14  ;;  %471 = vrot.lane.b32.xlu0 %v469_v43, %s1706_s14 }
  0x73   : > { %477 = vrot.lane.b32.xlu1 %v470_v42, %s1705_s10  ;;  %475 = vrot.lane.b32.xlu0 %v469_v43, %s1705_s10 }
  0x77   : > { %607 = vrot.lane.b32.xlu1 %v604_v52, %s1706_s14  ;;  %605 = vrot.lane.b32.xlu0 %v603_v53, %s1706_s14 }
  0x7b   : > { %611 = vrot.lane.b32.xlu1 %v604_v52, %s1705_s10  ;;  %609 = vrot.lane.b32.xlu0 %v603_v53, %s1705_s10 }
  0xc9   : > { %v415_v54 = vpop.permute.xlu1 %414  ;;  %v409_v56 = vpop.permute.xlu0 %408 }
  0xca   : > { %v420_v0 = vsel %vm418_vm3, %v415_v54, %v409_v56  ;;  %v424_v1 = vsel %vm422_vm4, %v409_v56, %v415_v54 }
  0xcb   : > { %v427_v5 = vadd.f32 %v424_v1, %v420_v0 }
  0xcd   : > { %v548_v58 = vpop.permute.xlu1 %547  ;;  %v407_v59 = vpop.permute.xlu0 %406  ;;  %v430_v11 = vmul.f32 0.5, %v427_v5 }
  0xcf   : > { %v433_v25 = vadd.f32 %v430_v11, %v1852_v12 }
  0xd1   : > { %v413_v60 = vpop.permute.xlu1 %412  ;;  %v546_v61 = vpop.permute.xlu0 %545  ;;  %v439_v34 = vrot.slane %v433_v25, 6 }
  0xd2   : > { %v419_v62 = vsel %vm418_vm3, %v413_v60, %v407_v59  ;;  %v423_v63 = vsel %vm422_vm4, %v407_v59, %v413_v60 }
  0xd3   : > { %v426_v2 = vadd.f32 %v423_v63, %v419_v62 }
  0xd5   : > { %v554_v3 = vpop.permute.xlu1 %553  ;;  %v552_v4 = vpop.permute.xlu0 %551  ;;  %v429_v6 = vmul.f32 0.5, %v426_v2 }
  0xd6   : > { %v558_v14 = vsel %vm418_vm3, %v554_v3, %v548_v58  ;;  %v561_v20 = vsel %vm422_vm4, %v548_v58, %v554_v3  ;;  %v557_v21 = vsel %vm418_vm3, %v552_v4, %v546_v61  ;;  %v560_v22 = vsel %vm422_vm4, %v546_v61, %v552_v4 }
  0xd7   : > { %v432_v18 = vadd.f32 %v429_v6, %v1862_v15  ;;  %v564_v28 = vadd.f32 %v561_v20, %v558_v14  ;;  %v563_v29 = vadd.f32 %v560_v22, %v557_v21 }
  0xd9   : > { %v417_v7 = vpop.permute.xlu1 %416  ;;  %v411_v8 = vpop.permute.xlu0 %410  ;;  %v438_v30 = vrot.slane %v432_v18, 6  ;;  %v567_v36 = vmul.f32 0.5, %v564_v28  ;;  %v566_v37 = vmul.f32 0.5, %v563_v29 }
  0xda   : > { %v421_v9 = vsel %vm418_vm3, %v417_v7, %v411_v8  ;;  %v425_v10 = vsel %vm422_vm4, %v411_v8, %v417_v7 }
  0xdb   : > { %v428_v16 = vadd.f32 %v425_v10, %v421_v9  ;;  %v440_v12 = vsel %vm437_vm5, %v438_v30, %v439_v34  ;;  %v570_v48 = vadd.f32 %v567_v36, %v1859_v13  ;;  %v569_v49 = vadd.f32 %v566_v37, %v1872_v19 }
  0xdc   : > { %v445_v50 = vsub.f32 %v433_v25, %v440_v12 }
  0xdd   : > { %v556_v23 = vpop.permute.xlu1 %555  ;;  %v550_v24 = vpop.permute.xlu0 %549  ;;  %v431_v27 = vmul.f32 0.5, %v428_v16  ;;  %v575_v61 = vrot.slane %v570_v48, 6  ;;  %v574_v62 = vrot.slane %v569_v49, 6 }
  0xde   : > { %v559_v15 = vsel %vm418_vm3, %v556_v23, %v550_v24  ;;  %v562_v33 = vsel %vm422_vm4, %v550_v24, %v556_v23  ;;  %v486_v63 = vmul.f32 %v445_v50, %v445_v50 }
  0xdf   : > { %v434_v35 = vadd.f32 %v431_v27, %v1865_v17  ;;  %v565_v38 = vadd.f32 %v562_v33, %v559_v15  ;;  %v444_v17 = vsub.f32 %v432_v18, %v438_v30  ;;  %v580_v14 = vsub.f32 %v569_v49, %v574_v62 }
  0xe1   : > { %v474_v31 = vpop.permute.xlu1 %473  ;;  %v472_v32 = vpop.permute.xlu0 %471  ;;  %v446_v45 = vsub.f32 %v434_v35, %v439_v34  ;;  %v568_v51 = vmul.f32 0.5, %v565_v38  ;;  %v485_v59 = vmul.f32 %v444_v17, %v444_v17  ;;  %v619_v24 = vmul.f32 %v580_v14, %v580_v14 }
  0xe3   : > { %v487_v56 = vmul.f32 %v446_v45, %v446_v45  ;;  %v571_v0 = vadd.f32 %v568_v51, %v1884_v26  ;;  %v576_v26 = vsel %vm437_vm5, %v574_v62, %v575_v61 }
  0xe4   : > { %v581_v21 = vsub.f32 %v570_v48, %v576_v26 }
  0xe5   : > { %v478_v39 = vpop.permute.xlu1 %477  ;;  %v476_v40 = vpop.permute.xlu0 %475  ;;  %v582_v18 = vsub.f32 %v571_v0, %v575_v61 }
  0xe6   : > { %v480_v41 = vsel %vm418_vm3, %v478_v39, %v474_v31  ;;  %v482_v42 = vsel %vm422_vm4, %v474_v31, %v478_v39  ;;  %v479_v43 = vsel %vm418_vm3, %v476_v40, %v472_v32  ;;  %v481_v44 = vsel %vm422_vm4, %v472_v32, %v476_v40 }
  0xe7   : > { %v484_v46 = vsub.f32 %v482_v42, %v480_v41  ;;  %v483_v47 = vsub.f32 %v481_v44, %v479_v43  ;;  %v621_v25 = vmul.f32 %v582_v18, %v582_v18  ;;  %v620_v28 = vmul.f32 %v581_v21, %v581_v21 }
  0xe9   : > { %v489_v52 = vmul.f32 %v484_v46, %v484_v46  ;;  %v488_v53 = vmul.f32 %v483_v47, %v483_v47  ;;  %v608_v54 = vpop.permute.xlu1 %607  ;;  %v606_v55 = vpop.permute.xlu0 %605 }
  0xeb   : > { %v493_v58 = vrot.slane %v489_v52, 6  ;;  %v492_v60 = vrot.slane %v488_v53, 6 }
  0xed   : > { %v500_v1 = vadd.f32 %v493_v58, %v487_v56  ;;  %v494_v13 = vsel %vm437_vm5, %v492_v60, %v493_v58  ;;  %v498_v2 = vadd.f32 %v492_v60, %v485_v59  ;;  %v612_v19 = vpop.permute.xlu1 %611  ;;  %v610_v3 = vpop.permute.xlu0 %609 }
  0xee   : > { %v499_v4 = vadd.f32 %v494_v13, %v486_v63  ;;  %v614_v5 = vsel %vm418_vm3, %v612_v19, %v608_v54  ;;  %v616_v6 = vsel %vm422_vm4, %v608_v54, %v612_v19  ;;  %v613_v7 = vsel %vm418_vm3, %v610_v3, %v606_v55 }
  0xef   : > { %v615_v8 = vsel %vm422_vm4, %v606_v55, %v610_v3  ;;  %v503_v9 = vadd.f32 1e-12, %v500_v1  ;;  %v618_v10 = vsub.f32 %v616_v6, %v614_v5  ;;  %v501_v16 = vadd.f32 1e-12, %v498_v2 }
  0xf0   : > { %v617_v11 = vsub.f32 %v615_v8, %v613_v7  ;;  %v502_v20 = vadd.f32 1e-12, %v499_v4 }
  0xf1   : > { %1549 = vrsqrt.f32 %v503_v9  ;;  %v623_v22 = vmul.f32 %v618_v10, %v618_v10  ;;  %vm520_vm6 = vcmp.eq.f32.partialorder %v503_v9, inf  ;;  %vm522_vm7 = vcmp.eq.f32.partialorder %v503_v9, 0.0 }
  0xf2   : > { %v622_v23 = vmul.f32 %v617_v11, %v617_v11  ;;  %1551 = vrsqrt.f32 %v501_v16  ;;  %v523_v40 = vand.u32 2147483648, %v503_v9  ;;  %vm506_vm8 = vcmp.eq.f32.partialorder %v501_v16, inf }
  0xf3   : > { %1553 = vrsqrt.f32 %v502_v20  ;;  %v627_v27 = vrot.slane %v623_v22, 6  ;;  %vm508_vm9 = vcmp.eq.f32.partialorder %v501_v16, 0.0  ;;  %v509_v41 = vand.u32 2147483648, %v501_v16 }
  0xf4   : > { %v626_v57 = vrot.slane %v622_v23, 6  ;;  %vm513_vm10 = vcmp.eq.f32.partialorder %v502_v20, inf  ;;  %vm515_vm11 = vcmp.eq.f32.partialorder %v502_v20, 0.0  ;;  %v516_v43 = vand.u32 2147483648, %v502_v20 }
  0xf5   : > { %v634_v29 = vadd.f32 %v627_v27, %v621_v25 }
  0xf6   : > { %v628_v30 = vsel %vm437_vm5, %v626_v57, %v627_v27  ;;  %v632_v31 = vadd.f32 %v626_v57, %v619_v24 }
  0xf7   : > { %v633_v32 = vadd.f32 %v628_v30, %v620_v28  ;;  %v637_v15 = vadd.f32 1e-12, %v634_v29 }
  0xf8   : > { %v635_v33 = vadd.f32 1e-12, %v632_v31 }
  0xf9   : > { %v636_v34 = vadd.f32 1e-12, %v633_v32  ;;  %1555 = vrsqrt.f32 %v637_v15  ;;  %vm654_vm12 = vcmp.eq.f32.partialorder %v637_v15, inf  ;;  %vm656_vm13 = vcmp.eq.f32.partialorder %v637_v15, 0.0 }
  0xfa   : > { %1557 = vrsqrt.f32 %v635_v33  ;;  %v657_v45 = vand.u32 2147483648, %v637_v15  ;;  %vm640_vm14 = vcmp.eq.f32.partialorder %v635_v33, inf  ;;  %vm642_vm15 = vcmp.eq.f32.partialorder %v635_v33, 0.0 }
  0xfb   : > { %1559 = vrsqrt.f32 %v636_v34  ;;  %v643_v52 = vand.u32 2147483648, %v635_v33  ;;  %vm647_vm0 = vcmp.eq.f32.partialorder %v636_v34, inf  ;;  %vm649_vm1 = vcmp.eq.f32.partialorder %v636_v34, 0.0 }
  0xfc   : > { %v650_v60 = vand.u32 2147483648, %v636_v34 }
  0xfe   : > { %v1550_v35 = vpop.eup %1549 }
  0xff   : > { %v1552_v36 = vpop.eup %1551  ;;  %v519_v12 = vmul.f32 %v1550_v35, %v503_v9 }
 0x100   : > { %v1554_v37 = vpop.eup %1553  ;;  %v505_v38 = vmul.f32 %v1552_v36, %v501_v16 }
 0x101   : > { %v512_v39 = vmul.f32 %v1554_v37, %v502_v20  ;;  %v521_v42 = vsel %vm520_vm6, %v503_v9, %v519_v12 }
 0x102   : > { %v507_v17 = vsel %vm506_vm8, %v501_v16, %v505_v38  ;;  %v524_v50 = vsel %vm522_vm7, %v523_v40, %v521_v42 }
 0x103   : > { %v514_v47 = vsel %vm513_vm10, %v502_v20, %v512_v39  ;;  %v510_v53 = vsel %vm508_vm9, %v509_v41, %v507_v17  ;;  %v661_v61 = vmul.f32 0.007874016, %v524_v50 }
 0x104   : > { %v517_v56 = vsel %vm515_vm11, %v516_v43, %v514_v47  ;;  %v659_v1 = vmul.f32 0.007874016, %v510_v53 }
 0x105   : > { %v660_v19 = vmul.f32 0.007874016, %v517_v56 }
 0x106   : > { %v1556_v44 = vpop.eup %1555 }
 0x107   : > { %v1558_v46 = vpop.eup %1557  ;;  %v653_v48 = vmul.f32 %v1556_v44, %v637_v15 }
 0x108   : > { %v1560_v49 = vpop.eup %1559  ;;  %v639_v51 = vmul.f32 %v1558_v46, %v635_v33 }
 0x109   : > { %v655_v54 = vsel %vm654_vm12, %v637_v15, %v653_v48  ;;  %v646_v55 = vmul.f32 %v1560_v49, %v636_v34 }
 0x10a   : > { %v658_v58 = vsel %vm656_vm13, %v657_v45, %v655_v54  ;;  %v641_v59 = vsel %vm640_vm14, %v635_v33, %v639_v51 }
 0x10b   : > { %v664_v62 = vmul.f32 0.032258064, %v658_v58  ;;  %v644_v63 = vsel %vm642_vm15, %v643_v52, %v641_v59  ;;  %v648_v0 = vsel %vm647_vm0, %v636_v34, %v646_v55 }
 0x10c   : > { %v651_v13 = vsel %vm649_vm1, %v650_v60, %v648_v0  ;;  %v662_v2 = vmul.f32 0.032258064, %v644_v63 }
 0x10d   : > { %v667_v3 = vadd.f32 %v664_v62, %v661_v61  ;;  %v663_v4 = vmul.f32 0.032258064, %v651_v13 }
 0x10e   : > { %v665_v5 = vadd.f32 %v662_v2, %v659_v1 }
 0x10f   : > { %v670_v6 = vmul.f32 0.5, %v667_v3  ;;  %v666_v7 = vadd.f32 %v663_v4, %v660_v19 }
 0x110   : > { %v668_v8 = vmul.f32 0.5, %v665_v5 }
 0x111   : > { %674 = vst [vmem:[%s671_s15 + $0xe] sm:$0x3] %v670_v6  ;;  %v669_v26 = vmul.f32 0.5, %v666_v7 }
 0x112   : > { %672 = vst [vmem:[%s671_s15 - $0x2] sm:$0xfc] %v668_v8 }
 0x113   : > { %673 = vst [vmem:[%s671_s15 + $0x6] sm:$0xff] %v669_v26 }
 0x114 PF: > { %p1410_p13 = scmp.ne.s32.totalorder %s1762_s19, 1 }
 0x115   : > { %s1707_s21 = smov (!%p1410_p13), 127   ;;  %s1708_s22 = smov (!%p1410_p13), 1  }
 0x116   : > { %678 = sbr.rel (%p1410_p13) target bundleno = 1201 (0x4b1), region = 44  ;;  %s1709_s29 = smov (!%p1410_p13), 3  }
 0x117   : > { %s1710_s30 = smov (!%p1410_p13), 126   ;;  %s1711_s5 = smov (!%p1410_p13), 124  }
 0x11b   : > { %v679_v9 = vld [vmem:[#allocation8 + $0xf] sm:$0x1]  ;;  %v680_v10 = vld [vmem:[#allocation8 + $0x10] sm:$0xff]  ;;  %vm685_vm2 = vcmask 1040384   ;;  %v681_v14 = vld [vmem:[#allocation8 + $0x18] sm:$0xff]  ;;  %vm742_vm3 = vcmask 1045504   ;;  %v697_v0 = vlaneseq }
 0x11c   : > { %v686_v11 = vrot.slane %v680_v10, 7  ;;  %v819_v16 = vld [vmem:[#allocation9 + $0x10] sm:$0xff]  ;;  %v820_v18 = vld [vmem:[#allocation9 + $0x18] sm:$0xff]  ;;  %v687_v20 = vrot.slane %v681_v14, 7  ;;  %v818_v57 = vld [vmem:[#allocation9 + $0xf] sm:$0x1] }
 0x11d   : > { %v682_v22 = vld [vmem:[#allocation8 + $0x1e] sm:$0x1]  ;;  %v824_v23 = vrot.slane %v819_v16, 7  ;;  %v825_v24 = vrot.slane %v820_v18, 7  ;;  %vm754_vm4 = vcmask 1046528   ;;  %v2060_v2 = vand.u32 127, %v697_v0 }
 0x11e   : > { %v1987_v21 = vsel %vm685_vm2, %v679_v9, %v686_v11  ;;  %v693_v25 = vrot.slane %v682_v22, 7  ;;  %v1994_v27 = vsel %vm685_vm2, %v686_v11, %v687_v20  ;;  %v821_v30 = vld [vmem:[#allocation9 + $0x1e] sm:$0x1]  ;;  %vm730_vm7 = vcmask 1041408  }
 0x11f   : > { %705 = vrot.lane.b32.xlu1 %v1987_v21, %s1707_s21  ;;  %699 = vrot.lane.b32.xlu0 %v1987_v21, %s1708_s22  ;;  %v2004_v29 = vsel %vm685_vm2, %v824_v23, %v825_v24  ;;  %v2007_v31 = vsel %vm685_vm2, %v818_v57, %v824_v23  ;;  %v744_v32 = vrot.slane %v1994_v27, 2  ;;  %v743_v33 = vrot.slane %v1987_v21, 2 }
 0x120   : > { %v1997_v28 = vsel %vm685_vm2, %v687_v20, %v693_v25  ;;  %v831_v34 = vrot.slane %v821_v30, 7  ;;  %v876_v39 = vrot.slane %v2004_v29, 2  ;;  %v756_v41 = vrot.slane %v1994_v27, 1 }
 0x121   : > { %v746_v15 = vrot.slane %v1997_v28, 2  ;;  %v745_v36 = vsel %vm742_vm3, %v743_v33, %v744_v32  ;;  %v758_v42 = vrot.slane %v1997_v28, 1  ;;  %v755_v43 = vrot.slane %v1987_v21, 1 }
 0x122   : > { %v2019_v37 = vsel %vm685_vm2, %v825_v24, %v831_v34  ;;  %v750_v38 = vadd.f32 %v745_v36, %v1987_v21  ;;  %v875_v44 = vrot.slane %v2007_v31, 2  ;;  %v887_v54 = vrot.slane %v2004_v29, 1 }
 0x123   : > { %707 = vrot.lane.b32.xlu1 %v1994_v27, %s1707_s21  ;;  %701 = vrot.lane.b32.xlu0 %v1994_v27, %s1708_s22  ;;  %v747_v35 = vsel %vm742_vm3, %v744_v32, %v746_v15  ;;  %v878_v40 = vrot.slane %v2019_v37, 2  ;;  %v759_v47 = vsel %vm754_vm4, %v756_v41, %v758_v42  ;;  %v757_v48 = vsel %vm754_vm4, %v755_v43, %v756_v41 }
 0x124   : > { %v751_v12 = vadd.f32 %v747_v35, %v1994_v27  ;;  %v752_v45 = vmul.f32 0.5, %v750_v38  ;;  %v877_v49 = vsel %vm742_vm3, %v875_v44, %v876_v39  ;;  %v889_v55 = vrot.slane %v2019_v37, 1 }
 0x125   : > { %v879_v46 = vsel %vm742_vm3, %v876_v39, %v878_v40  ;;  %v882_v53 = vadd.f32 %v877_v49, %v2007_v31  ;;  %v886_v56 = vrot.slane %v2007_v31, 1  ;;  %vm711_vm5 = vcmp.eq.s32.totalorder %v2060_v2, 0 }
 0x126   : > { %v753_v17 = vmul.f32 0.5, %v751_v12  ;;  %v883_v50 = vadd.f32 %v879_v46, %v2004_v29  ;;  %v762_v52 = vadd.f32 %v757_v48, %v752_v45  ;;  %v890_v60 = vsel %vm754_vm4, %v887_v54, %v889_v55 }
 0x127   : > { %837 = vrot.lane.b32.xlu1 %v2004_v29, %s1708_s22  ;;  %835 = vrot.lane.b32.xlu0 %v2007_v31, %s1708_s22  ;;  %v884_v59 = vmul.f32 0.5, %v882_v53  ;;  %v888_v61 = vsel %vm754_vm4, %v886_v56, %v887_v54  ;;  %vm715_vm6 = vcmp.eq.s32.totalorder %v2060_v2, 127 }
 0x128   : > { %v763_v51 = vadd.f32 %v759_v47, %v753_v17  ;;  %v885_v58 = vmul.f32 0.5, %v883_v50 }
 0x129   : > { %v893_v63 = vadd.f32 %v888_v61, %v884_v59 }
 0x12a   : > { %v894_v62 = vadd.f32 %v890_v60, %v885_v58 }
 0x12b   : > { %843 = vrot.lane.b32.xlu1 %v2004_v29, %s1707_s21  ;;  %841 = vrot.lane.b32.xlu0 %v2007_v31, %s1707_s21 }
 0x12f   : > { %709 = vrot.lane.b32.xlu1 %v1997_v28, %s1707_s21  ;;  %703 = vrot.lane.b32.xlu0 %v1997_v28, %s1708_s22 }
 0x133   : > { %845 = vrot.lane.b32.xlu1 %v2019_v37, %s1707_s21  ;;  %839 = vrot.lane.b32.xlu0 %v2019_v37, %s1708_s22 }
 0x137   : > { %766 = vrot.lane.b32.xlu1 %v763_v51, %s1708_s22  ;;  %764 = vrot.lane.b32.xlu0 %v762_v52, %s1708_s22 }
 0x13b   : > { %770 = vrot.lane.b32.xlu1 %v763_v51, %s1707_s21  ;;  %768 = vrot.lane.b32.xlu0 %v762_v52, %s1707_s21 }
 0x13f   : > { %897 = vrot.lane.b32.xlu1 %v894_v62, %s1708_s22  ;;  %895 = vrot.lane.b32.xlu0 %v893_v63, %s1708_s22 }
 0x143   : > { %901 = vrot.lane.b32.xlu1 %v894_v62, %s1707_s21  ;;  %899 = vrot.lane.b32.xlu0 %v893_v63, %s1707_s21 }
 0x191   : > { %v706_v1 = vpop.permute.xlu1 %705  ;;  %v700_v13 = vpop.permute.xlu0 %699 }
 0x192   : > { %v712_v8 = vsel %vm711_vm5, %v706_v1, %v700_v13  ;;  %v716_v26 = vsel %vm715_vm6, %v700_v13, %v706_v1 }
 0x193   : > { %v719_v14 = vadd.f32 %v716_v26, %v712_v8 }
 0x195   : > { %v708_v19 = vpop.permute.xlu1 %707  ;;  %v702_v3 = vpop.permute.xlu0 %701  ;;  %v722_v24 = vmul.f32 0.5, %v719_v14 }
 0x196   : > { %v713_v4 = vsel %vm711_vm5, %v708_v19, %v702_v3  ;;  %v717_v5 = vsel %vm715_vm6, %v702_v3, %v708_v19 }
 0x197   : > { %v720_v9 = vadd.f32 %v717_v5, %v713_v4  ;;  %v725_v36 = vadd.f32 %v722_v24, %v1987_v21 }
 0x199   : > { %v838_v6 = vpop.permute.xlu1 %837  ;;  %v836_v7 = vpop.permute.xlu0 %835  ;;  %v723_v16 = vmul.f32 0.5, %v720_v9  ;;  %v731_v44 = vrot.slane %v725_v36, 6 }
 0x19b   : > { %v726_v57 = vadd.f32 %v723_v16, %v1994_v27 }
 0x19d   : > { %v844_v10 = vpop.permute.xlu1 %843  ;;  %v842_v11 = vpop.permute.xlu0 %841  ;;  %v732_v27 = vrot.slane %v726_v57, 6 }
 0x19e   : > { %v848_v30 = vsel %vm711_vm5, %v844_v10, %v838_v6  ;;  %v851_v32 = vsel %vm715_vm6, %v838_v6, %v844_v10  ;;  %v847_v15 = vsel %vm711_vm5, %v842_v11, %v836_v7  ;;  %v850_v33 = vsel %vm715_vm6, %v836_v7, %v842_v11 }
 0x19f   : > { %v854_v38 = vadd.f32 %v851_v32, %v848_v30  ;;  %v853_v39 = vadd.f32 %v850_v33, %v847_v15  ;;  %v733_v21 = vsel %vm730_vm7, %v731_v44, %v732_v27 }
 0x1a0   : > { %v738_v58 = vsub.f32 %v726_v57, %v733_v21 }
 0x1a1   : > { %v710_v18 = vpop.permute.xlu1 %709  ;;  %v704_v20 = vpop.permute.xlu0 %703  ;;  %v857_v45 = vmul.f32 0.5, %v854_v38  ;;  %v856_v46 = vmul.f32 0.5, %v853_v39 }
 0x1a2   : > { %v714_v22 = vsel %vm711_vm5, %v710_v18, %v704_v20  ;;  %v718_v23 = vsel %vm715_vm6, %v704_v20, %v710_v18  ;;  %v779_v5 = vmul.f32 %v738_v58, %v738_v58 }
 0x1a3   : > { %v721_v25 = vadd.f32 %v718_v23, %v714_v22  ;;  %v860_v59 = vadd.f32 %v857_v45, %v2004_v29  ;;  %v859_v60 = vadd.f32 %v856_v46, %v2007_v31 }
 0x1a5   : > { %v846_v34 = vpop.permute.xlu1 %845  ;;  %v840_v35 = vpop.permute.xlu0 %839  ;;  %v724_v12 = vmul.f32 0.5, %v721_v25  ;;  %v865_v6 = vrot.slane %v860_v59, 6  ;;  %v864_v7 = vrot.slane %v859_v60, 6 }
 0x1a6   : > { %v849_v42 = vsel %vm711_vm5, %v846_v34, %v840_v35  ;;  %v852_v43 = vsel %vm715_vm6, %v840_v35, %v846_v34 }
 0x1a7   : > { %v727_v17 = vadd.f32 %v724_v12, %v1997_v28  ;;  %v855_v47 = vadd.f32 %v852_v43, %v849_v42  ;;  %v737_v28 = vsub.f32 %v725_v36, %v731_v44  ;;  %v870_v25 = vsub.f32 %v859_v60, %v864_v7 }
 0x1a9   : > { %v767_v40 = vpop.permute.xlu1 %766  ;;  %v765_v41 = vpop.permute.xlu0 %764  ;;  %v739_v54 = vsub.f32 %v727_v17, %v732_v27  ;;  %v858_v61 = vmul.f32 0.5, %v855_v47  ;;  %v778_v3 = vmul.f32 %v737_v28, %v737_v28  ;;  %v909_v35 = vmul.f32 %v870_v25, %v870_v25 }
 0x1ab   : > { %v780_v13 = vmul.f32 %v739_v54, %v739_v54  ;;  %v861_v8 = vadd.f32 %v858_v61, %v2019_v37  ;;  %v866_v37 = vsel %vm730_vm7, %v864_v7, %v865_v6 }
 0x1ac   : > { %v871_v15 = vsub.f32 %v860_v59, %v866_v37 }
 0x1ad   : > { %v771_v48 = vpop.permute.xlu1 %770  ;;  %v769_v49 = vpop.permute.xlu0 %768  ;;  %v872_v30 = vsub.f32 %v861_v8, %v865_v6 }
 0x1ae   : > { %v773_v50 = vsel %vm711_vm5, %v771_v48, %v767_v40  ;;  %v775_v51 = vsel %vm715_vm6, %v767_v40, %v771_v48  ;;  %v772_v52 = vsel %vm711_vm5, %v769_v49, %v765_v41  ;;  %v774_v53 = vsel %vm715_vm6, %v765_v41, %v769_v49 }
 0x1af   : > { %v777_v55 = vsub.f32 %v775_v51, %v773_v50  ;;  %v776_v56 = vsub.f32 %v774_v53, %v772_v52  ;;  %v911_v36 = vmul.f32 %v872_v30, %v872_v30  ;;  %v910_v38 = vmul.f32 %v871_v15, %v871_v15 }
 0x1b1   : > { %v782_v62 = vmul.f32 %v777_v55, %v777_v55  ;;  %v781_v63 = vmul.f32 %v776_v56, %v776_v56  ;;  %v898_v0 = vpop.permute.xlu1 %897  ;;  %v896_v1 = vpop.permute.xlu0 %895 }
 0x1b3   : > { %v786_v19 = vrot.slane %v782_v62, 6  ;;  %v785_v4 = vrot.slane %v781_v63, 6 }
 0x1b5   : > { %v793_v26 = vadd.f32 %v786_v19, %v780_v13  ;;  %v787_v9 = vsel %vm730_vm7, %v785_v4, %v786_v19  ;;  %v791_v29 = vadd.f32 %v785_v4, %v778_v3  ;;  %v902_v10 = vpop.permute.xlu1 %901  ;;  %v900_v31 = vpop.permute.xlu0 %899 }
 0x1b6   : > { %v792_v11 = vadd.f32 %v787_v9, %v779_v5  ;;  %v904_v14 = vsel %vm711_vm5, %v902_v10, %v898_v0  ;;  %v906_v16 = vsel %vm715_vm6, %v898_v0, %v902_v10  ;;  %v903_v18 = vsel %vm711_vm5, %v900_v31, %v896_v1  ;;  %v964_v10 = vld [vmem:[#allocation2] sm:$0xff] }
 0x1b7   : > { %v905_v20 = vsel %vm715_vm6, %v896_v1, %v900_v31  ;;  %v796_v22 = vadd.f32 1e-12, %v793_v26  ;;  %v908_v23 = vsub.f32 %v906_v16, %v904_v14  ;;  %v794_v57 = vadd.f32 1e-12, %v791_v29  ;;  %v965_v31 = vld [vmem:[#allocation2 + $0x8] sm:$0xff] }
 0x1b8   : > { %v907_v24 = vsub.f32 %v905_v20, %v903_v18  ;;  %v795_v32 = vadd.f32 1e-12, %v792_v11  ;;  %vm972_vm6 = vcmask 1042432  }
 0x1b9   : > { %1561 = vrsqrt.f32 %v796_v22  ;;  %v913_v33 = vmul.f32 %v908_v23, %v908_v23  ;;  %vm813_vm8 = vcmp.eq.f32.partialorder %v796_v22, inf  ;;  %vm815_vm9 = vcmp.eq.f32.partialorder %v796_v22, 0.0 }
 0x1ba   : > { %v912_v34 = vmul.f32 %v907_v24, %v907_v24  ;;  %1563 = vrsqrt.f32 %v794_v57  ;;  %v816_v49 = vand.u32 2147483648, %v796_v22  ;;  %vm799_vm10 = vcmp.eq.f32.partialorder %v794_v57, inf }
 0x1bb   : > { %1565 = vrsqrt.f32 %v795_v32  ;;  %v917_v12 = vrot.slane %v913_v33, 6  ;;  %vm801_vm11 = vcmp.eq.f32.partialorder %v794_v57, 0.0  ;;  %v802_v50 = vand.u32 2147483648, %v794_v57 }
 0x1bc   : > { %v916_v2 = vrot.slane %v912_v34, 6  ;;  %vm806_vm12 = vcmp.eq.f32.partialorder %v795_v32, inf  ;;  %vm808_vm13 = vcmp.eq.f32.partialorder %v795_v32, 0.0  ;;  %v809_v52 = vand.u32 2147483648, %v795_v32 }
 0x1bd   : > { %v924_v39 = vadd.f32 %v917_v12, %v911_v36  ;;  %v974_v23 = vrot.slane %v965_v31, 5 }
 0x1be   : > { %v918_v27 = vsel %vm730_vm7, %v916_v2, %v917_v12  ;;  %v922_v40 = vadd.f32 %v916_v2, %v909_v35  ;;  %vm1104_vm7 = vcmask 1039360  }
 0x1bf   : > { %v923_v41 = vadd.f32 %v918_v27, %v910_v38  ;;  %v927_v42 = vadd.f32 1e-12, %v924_v39 }
 0x1c0   : > { %v925_v43 = vadd.f32 1e-12, %v922_v40 }
 0x1c1   : > { %v926_v44 = vadd.f32 1e-12, %v923_v41  ;;  %1567 = vrsqrt.f32 %v927_v42  ;;  %vm944_vm14 = vcmp.eq.f32.partialorder %v927_v42, inf  ;;  %vm946_vm15 = vcmp.eq.f32.partialorder %v927_v42, 0.0 }
 0x1c2   : > { %1569 = vrsqrt.f32 %v925_v43  ;;  %v947_v54 = vand.u32 2147483648, %v927_v42  ;;  %vm930_vm0 = vcmp.eq.f32.partialorder %v925_v43, inf  ;;  %vm932_vm1 = vcmp.eq.f32.partialorder %v925_v43, 0.0 }
 0x1c3   : > { %1571 = vrsqrt.f32 %v926_v44  ;;  %v933_v62 = vand.u32 2147483648, %v925_v43  ;;  %vm937_vm2 = vcmp.eq.f32.partialorder %v926_v44, inf  ;;  %vm939_vm5 = vcmp.eq.f32.partialorder %v926_v44, 0.0 }
 0x1c4   : > { %v940_v4 = vand.u32 2147483648, %v926_v44 }
 0x1c6   : > { %v1562_v17 = vpop.eup %1561 }
 0x1c7   : > { %v1564_v45 = vpop.eup %1563  ;;  %v812_v21 = vmul.f32 %v1562_v17, %v796_v22 }
 0x1c8   : > { %v1566_v46 = vpop.eup %1565  ;;  %v798_v47 = vmul.f32 %v1564_v45, %v794_v57 }
 0x1c9   : > { %v805_v48 = vmul.f32 %v1566_v46, %v795_v32  ;;  %v814_v51 = vsel %vm813_vm8, %v796_v22, %v812_v21  ;;  %v973_v22 = vrot.slane %v964_v10, 5  ;;  %vm1149_vm8 = vcmask 1031168  }
 0x1ca   : > { %v800_v28 = vsel %vm799_vm10, %v794_v57, %v798_v47  ;;  %v817_v60 = vsel %vm815_vm9, %v816_v49, %v814_v51  ;;  %vm1194_vm9 = vcmask 1014784  }
 0x1cb   : > { %v807_v56 = vsel %vm806_vm12, %v795_v32, %v805_v48  ;;  %v803_v63 = vsel %vm801_vm11, %v802_v50, %v800_v28  ;;  %v951_v5 = vmul.f32 0.007874016, %v817_v60  ;;  %v975_v57 = vsel %vm972_vm6, %v973_v22, %v974_v23 }
 0x1cc   : > { %v810_v13 = vsel %vm808_vm13, %v809_v52, %v807_v56  ;;  %v949_v26 = vmul.f32 0.007874016, %v803_v63  ;;  %v985_v30 = vsel %vm972_vm6, -3e+38, %v973_v22  ;;  %v990_v32 = vrot.slane %v975_v57, 1 }
 0x1cd   : > { %v950_v11 = vmul.f32 0.007874016, %v810_v13  ;;  %v989_v15 = vrot.slane %v985_v30, 1 }
 0x1ce   : > { %v1568_v53 = vpop.eup %1567 }
 0x1cf   : > { %v1570_v55 = vpop.eup %1569  ;;  %v943_v58 = vmul.f32 %v1568_v53, %v927_v42  ;;  %v991_v35 = vsel %vm754_vm4, %v989_v15, %v990_v32 }
 0x1d0   : > { %v1572_v59 = vpop.eup %1571  ;;  %v929_v61 = vmul.f32 %v1570_v55, %v925_v43  ;;  %v1003_v27 = vmax.f32 %v985_v30, %v991_v35 }
 0x1d1   : > { %v945_v0 = vsel %vm944_vm14, %v927_v42, %v943_v58  ;;  %v936_v1 = vmul.f32 %v1572_v59, %v926_v44 }
 0x1d2   : > { %v948_v19 = vsel %vm946_vm15, %v947_v54, %v945_v0  ;;  %v931_v3 = vsel %vm930_vm0, %v925_v43, %v929_v61  ;;  %v1013_v48 = vrot.slane %v1003_v27, 2 }
 0x1d3   : > { %v954_v6 = vmul.f32 0.032258064, %v948_v19  ;;  %v934_v7 = vsel %vm932_vm1, %v933_v62, %v931_v3  ;;  %v938_v8 = vsel %vm937_vm2, %v926_v44, %v936_v1 }
 0x1d4   : > { %v941_v9 = vsel %vm939_vm5, %v940_v4, %v938_v8  ;;  %v952_v29 = vmul.f32 0.032258064, %v934_v7 }
 0x1d5   : > { %v957_v14 = vadd.f32 %v954_v6, %v951_v5  ;;  %v953_v16 = vmul.f32 0.032258064, %v941_v9 }
 0x1d6   : > { %v955_v18 = vadd.f32 %v952_v29, %v949_v26 }
 0x1d7   : > { %v960_v20 = vmul.f32 0.5, %v957_v14  ;;  %v956_v37 = vadd.f32 %v953_v16, %v950_v11 }
 0x1d8   : > { %v958_v24 = vmul.f32 0.5, %v955_v18 }
 0x1d9   : > { %963 = vst [vmem:[#allocation2 + $0x1e] sm:$0x3] %v960_v20  ;;  %v959_v25 = vmul.f32 0.5, %v956_v37 }
 0x1da   : > { %961 = vst [vmem:[#allocation2 + $0xe] sm:$0xfc] %v958_v24 }
 0x1db   : > { %962 = vst [vmem:[#allocation2 + $0x16] sm:$0xff] %v959_v25 }
 0x1e2   : > { %v966_v33 = vld [vmem:[#allocation2 + $0x10] sm:$0xff]  ;;  %v967_v34 = vld [vmem:[#allocation2 + $0x18] sm:$0xff] }
 0x1e3   : > { %v976_v36 = vrot.slane %v966_v33, 5  ;;  %v978_v12 = vrot.slane %v967_v34, 5 }
 0x1e5   : > { %v977_v2 = vsel %vm972_vm6, %v974_v23, %v976_v36  ;;  %v979_v38 = vsel %vm972_vm6, %v976_v36, %v978_v12  ;;  %v986_v39 = vsel %vm972_vm6, %v978_v12, -3e+38 }
 0x1e6   : > { %v992_v40 = vrot.slane %v977_v2, 1  ;;  %v994_v41 = vrot.slane %v979_v38, 1  ;;  %v996_v42 = vrot.slane %v986_v39, 1 }
 0x1e8   : > { %v993_v43 = vsel %vm754_vm4, %v990_v32, %v992_v40  ;;  %v995_v44 = vsel %vm754_vm4, %v992_v40, %v994_v41  ;;  %v997_v17 = vsel %vm754_vm4, %v994_v41, %v996_v42  ;;  %v1007_v45 = vmax.f32 %v986_v39, %v996_v42 }
 0x1e9   : > { %v1004_v46 = vmax.f32 %v975_v57, %v993_v43  ;;  %v1005_v21 = vmax.f32 %v977_v2, %v995_v44  ;;  %v1006_v47 = vmax.f32 %v979_v38, %v997_v17  ;;  %vm1037_vm4 = vcmask 1043456  }
 0x1ea   : > { %v1020_v49 = vrot.slane %v1007_v45, 2 }
 0x1eb   : > { %v1014_v50 = vrot.slane %v1004_v46, 2  ;;  %v1016_v51 = vrot.slane %v1005_v21, 2  ;;  %v1018_v52 = vrot.slane %v1006_v47, 2 }
 0x1ec   : > { %v1031_v53 = vmax.f32 %v1007_v45, %v1020_v49 }
 0x1ed   : > { %v1017_v28 = vsel %vm742_vm3, %v1014_v50, %v1016_v51  ;;  %v1019_v54 = vsel %vm742_vm3, %v1016_v51, %v1018_v52  ;;  %v1015_v55 = vsel %vm742_vm3, %v1013_v48, %v1014_v50  ;;  %v1021_v56 = vsel %vm742_vm3, %v1018_v52, %v1020_v49 }
 0x1ee   : > { %v1028_v58 = vmax.f32 %v1004_v46, %v1017_v28  ;;  %v1029_v59 = vmax.f32 %v1005_v21, %v1019_v54  ;;  %v1027_v60 = vmax.f32 %v1003_v27, %v1015_v55  ;;  %v1030_v61 = vmax.f32 %v1006_v47, %v1021_v56 }
 0x1ef   : > { %v1045_v3 = vrot.slane %v1031_v53, 4  ;;  %vm1071_vm3 = vcmask 23552  }
 0x1f0   : > { %v1039_v62 = vrot.slane %v1028_v58, 4  ;;  %v1041_v63 = vrot.slane %v1029_v59, 4  ;;  %v1038_v0 = vrot.slane %v1027_v60, 4  ;;  %v1043_v1 = vrot.slane %v1030_v61, 4 }
 0x1f2   : > { %v1042_v13 = vsel %vm1037_vm4, %v1039_v62, %v1041_v63  ;;  %v1040_v19 = vsel %vm1037_vm4, %v1038_v0, %v1039_v62  ;;  %v1046_v6 = vsel %vm1037_vm4, %v1043_v1, %v1045_v3  ;;  %v1044_v7 = vsel %vm1037_vm4, %v1041_v63, %v1043_v1 }
 0x1f3   : > { %v1052_v4 = vmax.f32 %v1028_v58, %v1042_v13  ;;  %v1051_v5 = vmax.f32 %v1027_v60, %v1040_v19  ;;  %v1054_v8 = vmax.f32 %v1030_v61, %v1046_v6  ;;  %v1053_v26 = vmax.f32 %v1029_v59, %v1044_v7 }
 0x1f5   : > { %1061 = vrot.lane.b32.xlu1 %v1052_v4, %s1709_s29  ;;  %1059 = vrot.lane.b32.xlu0 %v1051_v5, %s1709_s29 }
 0x1f9   : > { %1065 = vrot.lane.b32.xlu1 %v1054_v8, %s1709_s29  ;;  %1063 = vrot.lane.b32.xlu0 %v1053_v26, %s1709_s29 }
 0x267   : > { %v1060_v9 = vpop.permute.xlu0 %1059  ;;  %v1062_v31 = vpop.permute.xlu1 %1061 }
 0x268   : > { %v1076_v29 = vsel %vm1071_vm3, %v1060_v9, -3e+38  ;;  %v1072_v10 = vsel %vm1071_vm3, -3e+38, %v1060_v9  ;;  %v1077_v11 = vsel %vm1071_vm3, %v1062_v31, -3e+38 }
 0x269   : > { %1090 = vrot.lane.b32.xlu1 %v1076_v29, %s1707_s21  ;;  %1088 = vrot.lane.b32.xlu0 %v1072_v10, %s1707_s21  ;;  %v1073_v14 = vsel %vm1071_vm3, -3e+38, %v1062_v31 }
 0x26b   : > { %v1064_v16 = vpop.permute.xlu0 %1063  ;;  %v1066_v37 = vpop.permute.xlu1 %1065 }
 0x26c   : > { %v1078_v18 = vsel %vm1071_vm3, %v1064_v16, -3e+38  ;;  %v1074_v20 = vsel %vm1071_vm3, -3e+38, %v1064_v16  ;;  %v1079_v22 = vsel %vm1071_vm3, %v1066_v37, -3e+38 }
 0x26d   : > { %1094 = vrot.lane.b32.xlu1 %v1077_v11, %s1707_s21  ;;  %1092 = vrot.lane.b32.xlu0 %v1073_v14, %s1707_s21  ;;  %v1075_v23 = vsel %vm1071_vm3, -3e+38, %v1066_v37 }
 0x271   : > { %1098 = vrot.lane.b32.xlu1 %v1078_v18, %s1707_s21  ;;  %1096 = vrot.lane.b32.xlu0 %v1074_v20, %s1707_s21 }
 0x275   : > { %1102 = vrot.lane.b32.xlu1 %v1079_v22, %s1707_s21  ;;  %1100 = vrot.lane.b32.xlu0 %v1075_v23, %s1707_s21 }
 0x2db   : > { %v1091_v24 = vpop.permute.xlu1 %1090  ;;  %v1089_v25 = vpop.permute.xlu0 %1088 }
 0x2dc   : > { %v1118_v57 = vmax.f32 %v1076_v29, %v1091_v24  ;;  %v1105_v30 = vsel %vm1104_vm7, %v1089_v25, %v1091_v24 }
 0x2dd   : > { %v1117_v32 = vmax.f32 %v1072_v10, %v1105_v30 }
 0x2de   : > { %1135 = vrot.lane.b32.xlu1 %v1118_v57, %s1710_s30 }
 0x2df   : > { %v1095_v15 = vpop.permute.xlu1 %1094  ;;  %1133 = vrot.lane.b32.xlu0 %v1117_v32, %s1710_s30  ;;  %v1093_v33 = vpop.permute.xlu0 %1092 }
 0x2e0   : > { %v1120_v34 = vmax.f32 %v1077_v11, %v1095_v15  ;;  %v1106_v35 = vsel %vm1104_vm7, %v1093_v33, %v1095_v15 }
 0x2e1   : > { %v1119_v36 = vmax.f32 %v1073_v14, %v1106_v35 }
 0x2e2   : > { %1139 = vrot.lane.b32.xlu1 %v1120_v34, %s1710_s30 }
 0x2e3   : > { %v1099_v12 = vpop.permute.xlu1 %1098  ;;  %1137 = vrot.lane.b32.xlu0 %v1119_v36, %s1710_s30  ;;  %v1097_v2 = vpop.permute.xlu0 %1096 }
 0x2e4   : > { %v1122_v38 = vmax.f32 %v1078_v18, %v1099_v12  ;;  %v1107_v39 = vsel %vm1104_vm7, %v1097_v2, %v1099_v12 }
 0x2e5   : > { %v1121_v27 = vmax.f32 %v1074_v20, %v1107_v39  ;;  %v1712_v39 = vmov 0  }
 0x2e6   : > { %1143 = vrot.lane.b32.xlu1 %v1122_v38, %s1710_s30 }
 0x2e7   : > { %v1103_v40 = vpop.permute.xlu1 %1102  ;;  %1141 = vrot.lane.b32.xlu0 %v1121_v27, %s1710_s30  ;;  %v1101_v41 = vpop.permute.xlu0 %1100 }
 0x2e8   : > { %v1124_v42 = vmax.f32 %v1079_v22, %v1103_v40  ;;  %v1108_v43 = vsel %vm1104_vm7, %v1101_v41, %v1103_v40 }
 0x2e9   : > { %v1123_v44 = vmax.f32 %v1075_v23, %v1108_v43 }
 0x2ea   : > { %1147 = vrot.lane.b32.xlu1 %v1124_v42, %s1710_s30 }
 0x2eb   : > { %1145 = vrot.lane.b32.xlu0 %v1123_v44, %s1710_s30 }
 0x350   : > { %v1136_v17 = vpop.permute.xlu1 %1135 }
 0x351   : > { %v1163_v45 = vmax.f32 %v1118_v57, %v1136_v17  ;;  %v1134_v46 = vpop.permute.xlu0 %1133 }
 0x352   : > { %v1150_v21 = vsel %vm1149_vm8, %v1134_v46, %v1136_v17 }
 0x353   : > { %v1162_v47 = vmax.f32 %v1117_v32, %v1150_v21  ;;  %1180 = vrot.lane.b32.xlu1 %v1163_v45, %s1711_s5 }
 0x354   : > { %v1140_v48 = vpop.permute.xlu1 %1139 }
 0x355   : > { %v1165_v49 = vmax.f32 %v1120_v34, %v1140_v48  ;;  %1178 = vrot.lane.b32.xlu0 %v1162_v47, %s1711_s5  ;;  %v1138_v50 = vpop.permute.xlu0 %1137 }
 0x356   : > { %v1151_v51 = vsel %vm1149_vm8, %v1138_v50, %v1140_v48 }
 0x357   : > { %v1164_v52 = vmax.f32 %v1119_v36, %v1151_v51  ;;  %1184 = vrot.lane.b32.xlu1 %v1165_v49, %s1711_s5 }
 0x358   : > { %v1144_v53 = vpop.permute.xlu1 %1143 }
 0x359   : > { %v1167_v28 = vmax.f32 %v1122_v38, %v1144_v53  ;;  %1182 = vrot.lane.b32.xlu0 %v1164_v52, %s1711_s5  ;;  %v1142_v54 = vpop.permute.xlu0 %1141 }
 0x35a   : > { %v1152_v55 = vsel %vm1149_vm8, %v1142_v54, %v1144_v53 }
 0x35b   : > { %v1166_v56 = vmax.f32 %v1121_v27, %v1152_v55  ;;  %1188 = vrot.lane.b32.xlu1 %v1167_v28, %s1711_s5 }
 0x35c   : > { %v1148_v58 = vpop.permute.xlu1 %1147 }
 0x35d   : > { %v1169_v59 = vmax.f32 %v1124_v42, %v1148_v58  ;;  %1186 = vrot.lane.b32.xlu0 %v1166_v56, %s1711_s5  ;;  %v1146_v60 = vpop.permute.xlu0 %1145 }
 0x35e   : > { %v1153_v61 = vsel %vm1149_vm8, %v1146_v60, %v1148_v58 }
 0x35f   : > { %v1168_v62 = vmax.f32 %v1123_v44, %v1153_v61  ;;  %1192 = vrot.lane.b32.xlu1 %v1169_v59, %s1711_s5 }
 0x361   : > { %1190 = vrot.lane.b32.xlu0 %v1168_v62, %s1711_s5 }
 0x3c5   : > { %v1181_v63 = vpop.permute.xlu1 %1180 }
 0x3c7   : > { %v1179_v0 = vpop.permute.xlu0 %1178 }
 0x3c8   : > { %v1195_v5 = vsel %vm1194_vm9, %v1179_v0, %v1181_v63 }
 0x3c9   : > { %v1185_v1 = vpop.permute.xlu1 %1184  ;;  %v1203_v29 = vmax.f32 %v1162_v47, %v1195_v5 }
 0x3cb   : > { %v1183_v13 = vpop.permute.xlu0 %1182 }
 0x3cc   : > { %v1196_v4 = vsel %vm1194_vm9, %v1183_v13, %v1185_v1 }
 0x3cd   : > { %v1189_v19 = vpop.permute.xlu1 %1188  ;;  %v1204_v7 = vmax.f32 %v1164_v52, %v1196_v4 }
 0x3cf   : > { %v1187_v3 = vpop.permute.xlu0 %1186  ;;  %v1219_v11 = vmax.f32 %v1203_v29, %v1204_v7  ;;  %v1207_v16 = vmin.f32 %v1203_v29, %v1204_v7 }
 0x3d0   : > { %v1197_v6 = vsel %vm1194_vm9, %v1187_v3, %v1189_v19 }
 0x3d1   : > { %v1193_v8 = vpop.permute.xlu1 %1192  ;;  %v1205_v10 = vmax.f32 %v1166_v56, %v1197_v6 }
 0x3d3   : > { %v1191_v26 = vpop.permute.xlu0 %1190 }
 0x3d4   : > { %v1198_v9 = vsel %vm1194_vm9, %v1191_v26, %v1193_v8 }
 0x3d5   : > { %v1206_v31 = vmax.f32 %v1168_v62, %v1198_v9 }
 0x3d7   : > { %v1220_v14 = vmax.f32 %v1205_v10, %v1206_v31  ;;  %v1208_v18 = vmin.f32 %v1205_v10, %v1206_v31 }
 0x3d9   : > { %v1221_v20 = vmax.f32 %v1219_v11, %v1220_v14  ;;  %v1209_v37 = vmin.f32 %v1207_v16, %v1208_v18 }
 0x3db   : > { %1222 = vmax.xlane.f32.xlu1 %v1221_v20  ;;  %1210 = vmin.xlane.f32.xlu0 %v1209_v37 }
 0x464   : > { %v1223_v22 = vpop.xlane.xlu1 %1222  ;;  %v1211_v23 = vpop.xlane.xlu0 %1210 }
 0x465   : > { %v1224_v24 = vrot.slane %v1223_v22, 4  ;;  %v1212_v25 = vrot.slane %v1211_v23, 4 }
 0x467   : > { %v1225_v57 = vmax.f32 %v1223_v22, %v1224_v24  ;;  %v1213_v30 = vmin.f32 %v1211_v23, %v1212_v25 }
 0x469   : > { %v1226_v32 = vrot.slane %v1225_v57, 2  ;;  %v1214_v15 = vrot.slane %v1213_v30, 2 }
 0x46b   : > { %v1227_v33 = vmax.f32 %v1225_v57, %v1226_v32  ;;  %v1215_v34 = vmin.f32 %v1213_v30, %v1214_v15 }
 0x46d   : > { %v1216_v35 = vrot.slane %v1215_v34, 1  ;;  %v1228_v36 = vrot.slane %v1227_v33, 1 }
 0x46f   : > { %v1217_v12 = vmin.f32 %v1215_v34, %v1216_v35  ;;  %v1229_v2 = vmax.f32 %v1227_v33, %v1228_v36 }
 0x471   : > { %1452 = vpush %v1217_v12 }
 0x472   : > { %1454 = vpush %v1229_v2 }
 0x4a2   : > { %s1453_s9 = spop %1452 }
 0x4a3   : > { %s1455_s24 = spop %1454 }
 0x4a4   : > { %s1231_s26 = ssub.f32 %s1455_s24, %s1453_s9 }
 0x4a6   : > { %s1232_s18 = smul.f32 0.025, %s1231_s26 }
 0x4a8   : > { %s1233_s25 = sadd.f32 %s1453_s9, %s1232_s18 }
 0x4aa   : > { %v1234_v38 = vstv %s1233_s25 }
 0x4ab   : > { %vm1235_vm10 = vcmp.gt.f32.partialorder %v1203_v29, %v1234_v38  ;;  %vm1236_vm11 = vcmp.gt.f32.partialorder %v1204_v7, %v1234_v38  ;;  %vm1237_vm12 = vcmp.gt.f32.partialorder %v1205_v10, %v1234_v38  ;;  %vm1238_vm13 = vcmp.gt.f32.partialorder %v1206_v31, %v1234_v38 }
 0x4ac   : > { %vm1239_vm14 = vmpackc.low %vm1236_vm11, %vm1235_vm10 }
 0x4ad   : > { %vm1240_vm15 = vmpackc.low %vm1238_vm13, %vm1237_vm12 }
 0x4ae   : > { %vm1241_vm0 = vmpackc.even %vm1240_vm15, %vm1239_vm14 }
 0x4af   : > { %v1242_v27 = vsel %vm1241_vm0, 16843009, %v1712_v39 }
 0x4b0   : > { %1243 = vst [vmem:[#allocation11] sm:$0xff] %v1242_v27 }
 0x4b1 PF: > { %p1486_p0 = scmp.eq.s32.totalorder %s1762_s19, 1  ;;  %s1713_s6 = smov [#allocation9]  }
 0x4b2   : > { %s1263_s11 = sshll.u32 %s1713_s6, 4  ;;  %s1714_s8 = smov [#allocation8]   ;;  %s1264_s11 = int_to_ptr.vmem [resolvable:$true] %s1263_s11 }
 0x4b3   : > { %s1250_s12 = sshll.u32 %s1714_s8, 4  ;;  %s1573_s13 = scalar_lea.vmem %s1264_s11, 512  ;;  %s1251_s12 = int_to_ptr.vmem [resolvable:$true] %s1250_s12 }
 0x4b4   : > { %p1574_p1 = scmp.ne.s32.totalorder %s1264_s11, %s1573_s13  ;;  %p1580_p4 = scmp.lt.s32.totalorder %s1264_s11, %s1264_s11 }
 0x4b5   : > { %p1581_p5 = scmp.lt.s32.totalorder %s1573_s13, %s1573_s13 }
 0x4b6   : > { %p1575_p2 = pnand %p1574_p1, %p1486_p0 }
 0x4b7   : > { %p1582_p6 = por %p1581_p5, %p1580_p4 }
 0x4b8   : > { %p1576_p3 = pneg %p1575_p2 }
 0x4ba   : > { %p1583_p7 = pnand %p1582_p6, %p1576_p3 }
 0x4bc   : > { %1586 = shalt.err (!%p1583_p7)
}
 0x4bd   : > { %s1715_s7 = smov 128   ;;  %s1716_s10 = smov 8  }
 0x4be   : > { %1477 = dma.vmem_to_hbm [thread:$0]  (%p1486_p0), %s1264_s11, 512, %s2202_s3, [#allocation10], %s1715_s7, %s1715_s7, %s1716_s10  }
 0x4bf   : > { %s1597_s28 = scalar_lea.vmem %s1251_s12, 512  ;;  %p1604_p11 = scmp.lt.s32.totalorder %s1251_s12, %s1251_s12 }
 0x4c0   : > { %p1598_p8 = scmp.ne.s32.totalorder %s1251_s12, %s1597_s28  ;;  %p1605_p12 = scmp.lt.s32.totalorder %s1597_s28, %s1597_s28 }
 0x4c2   : > { %p1599_p9 = pnand %p1598_p8, %p1486_p0  ;;  %p1606_p13 = por %p1605_p12, %p1604_p11 }
 0x4c4   : > { %p1600_p10 = pneg %p1599_p9 }
 0x4c6   : > { %p1607_p1 = pnand %p1606_p13, %p1600_p10 }
 0x4c8   : > { %1610 = shalt.err (!%p1607_p1)
}
 0x4c9   : > { %1475 = dma.vmem_to_hbm [thread:$0]  (%p1486_p0), %s1251_s12, 512, %s2201_s2, [#allocation5], %s1715_s7, %s1715_s7, %s1716_s10  }
 0x4ca   : > { %s1717_s22 = smov [#allocation11]  }
 0x4cb   : > { %s1277_s29 = sshll.u32 %s1717_s22, 4  ;;  %s1278_s29 = int_to_ptr.vmem [resolvable:$true] %s1277_s29 }
 0x4cc   : > { %s1621_s30 = scalar_lea.vmem %s1278_s29, 128  ;;  %p1628_p5 = scmp.lt.s32.totalorder %s1278_s29, %s1278_s29 }
 0x4cd   : > { %p1622_p2 = scmp.ne.s32.totalorder %s1278_s29, %s1621_s30  ;;  %p1629_p6 = scmp.lt.s32.totalorder %s1621_s30, %s1621_s30 }
 0x4cf   : > { %p1623_p3 = pnand %p1622_p2, %p1486_p0  ;;  %p1630_p7 = por %p1629_p6, %p1628_p5 }
 0x4d1   : > { %p1624_p4 = pneg %p1623_p3 }
 0x4d3   : > { %p1631_p8 = pnand %p1630_p7, %p1624_p4 }
 0x4d5   : > { %1634 = shalt.err (!%p1631_p8)
}
 0x4d6   : > { %1479 = dma.vmem_to_hbm [thread:$0]  (%p1486_p0), %s1278_s29, 128, %s2203_s4, [#allocation10]  }
 0x4d7   : > { %1670 = dma.done.wait (%p1486_p0), [#allocation5], 512  }
 0x4d8   : > { %1672 = vsyncadd (%p1486_p0), [#allocation5], 4294966784 }
 0x4d9   : > { %1674 = dma.done.wait (%p1486_p0), [#allocation10], 640  }
 0x4da   : > { %1676 = vsyncadd (%p1486_p0), [#allocation10], 4294966656 }
 0x4db PF: > { %p20_p9 = scmp.ge.s32.totalorder %s1765_s20, 4   ;;  %s2206_s15 = smov %s1683_s16 }
 0x4dc   : > { %s2207_s16 = smov %s1687_s17  ;;  %s2208_s17 = smov %s1775_s23 }
 0x4dd   : > { %s2209_s18 = smov %s1765_s20  ;;  %22 = sbr.rel (!%p20_p9) target bundleno = 7 (0x7), region = 121 }
 0x4e2   :  { %1298 = vsyncpa [#allocation4], 1 }
 0x4e3   :  { %1300 = vsyncpa [#allocation4 + $0x1], 1 }
 0x4e4   :  { %1301 = vsyncpa [#allocation7], 1 }
 0x4e5   :  { %1303 = vsyncpa [#allocation7 + $0x1], 1 }
 0x4e6   :  { %1304 = vsyncpa [#allocation5], 1 }
 0x4e7   :  { %1306 = vsyncpa [#allocation5 + $0x1], 1 }
 0x4e8   :  { %1307 = vsyncpa [#allocation10], 1 }

</bundles_post_ra>
